<compile_context>
chip_gen: v7x
topology: tpu7x:2x2x1
jax: 0.10.0
libtpu: 0.0.40
codegen_flags: <defaults>
</compile_context>

<pallas_src>
import functools

import jax
import jax.numpy as jnp
from jax.experimental import pallas as pl
from jax.experimental.pallas import tpu as pltpu

LANE = 128  # vreg lane width; all packed buffers use this lane count


# -----------------------------------------------------------------------------
# Kernel
# -----------------------------------------------------------------------------
def gat_kernel(heads, n, hidden, w_ref, f_ref, o_ref, blk_ref):
    """Whole forward pass; everything VMEM resident (toy graph sizes).

    w_ref : bf16 [NH + LANE + heads*hidden + hidden, LANE] packed:
              [0       : NH)        kron(I_heads, x), lanes zero-padded to LANE
              [NH      : NH+LANE)   layer-0 augmented weight (K padded to LANE)
              [NH+LANE : +HC)       layer-1 augmented weight (K = heads*hidden)
              [...     : +hidden)   output Linear weight (lanes padded to LANE)
            augmented-weight head block h (rows) = [W_h | W_h a_src_h | W_h a_dst_h | 0]
    f_ref : f32 [NH + 24, LANE]:
              rows 0:NH, lanes 0:NH  additive block-diag adjacency mask (0 / -1e30)
              row NH: bias1, row NH+8: bias2, row NH+16: output bias (-1e30 in pads)
    o_ref : f32 [n, LANE] log-softmax (wrapper slices the real classes)
    blk_ref: bf16 [NH, heads*hidden] scratch for kron(I_heads, h1)
    """
    f32 = jnp.float32
    bf16 = jnp.bfloat16
    NH = heads * n
    HC = heads * hidden
    C = hidden

    mask_bias = f_ref[0:NH, 0:NH]                       # additive adjacency mask
    b1 = f_ref[NH:NH + 1, 0:C]                          # [1, C]
    b2 = f_ref[NH + 8:NH + 9, 0:C]                      # [1, C]
    b_out = f_ref[NH + 16:NH + 17, :]                   # [1, LANE], -1e30 in pads

    def elu(v):
        return jnp.where(v > 0, v, jnp.exp(jnp.minimum(v, 0.0)) - 1.0)

    def gat_attention(hw_aug):
        # hw_aug: [NH, LANE] f32, row r = h*n + i:
        #   cols [0:C) = W_h x_i, col C = a_src score, col C+1 = a_dst score.
        a_src = hw_aug[:, C:C + 1]                      # [NH, 1]
        a_dst = hw_aug[:, C + 1:C + 2]                  # [NH, 1]
        e = a_dst + jnp.transpose(a_src)                # [NH, NH]: rows=target, cols=source
        e = jnp.maximum(e, 0.2 * e)                     # LeakyReLU(0.2)
        e = e + mask_bias                               # block-diag adjacency mask (additive)
        m = jnp.max(e, axis=-1, keepdims=True)          # lane-dense 128-wide reduce
        p = jnp.exp(e - m)
        # fold the 1/heads head-mean into the softmax denominator (cheap [NH,1] scale)
        denom = jnp.sum(p, axis=-1, keepdims=True) * heads
        p = p * pl.reciprocal(denom, approx=True)
        # ONE MXU push: block-diagonal p against head-major transformed features
        ctx = jnp.dot(p, hw_aug, preferred_element_type=f32)        # [NH, LANE]
        # head-mean (1/heads already folded) via static sublane-slice adds
        out = ctx[0:n, 0:C]
        for h in range(1, heads):
            out = out + ctx[h * n:(h + 1) * n, 0:C]
        return out                                      # [n, C]

    # ---- layer 0: one fused matmul gives features + a_src + a_dst --------------
    hw0 = jnp.dot(w_ref[0:NH, :], w_ref[NH:NH + LANE, :],
                  preferred_element_type=f32)           # [NH, LANE]
    h1 = elu(gat_attention(hw0) + b1)                   # [n, C]

    # ---- layer 1: build kron(I_heads, h1) once, then one fused matmul ----------
    blk_ref[...] = jnp.zeros((NH, HC), bf16)
    h1b = h1.astype(bf16)
    for h in range(heads):                              # 8 static block stores
        blk_ref[h * n:(h + 1) * n, h * C:(h + 1) * C] = h1b
    r2 = NH + LANE
    hw1 = jnp.dot(blk_ref[...], w_ref[r2:r2 + HC, :],
                  preferred_element_type=f32)           # [NH, LANE]
    h2 = elu(gat_attention(hw1) + b2)                   # [n, C]

    # ---- output Linear + log_softmax (lane-padded; pad logits biased to -1e30) -
    r3 = r2 + HC
    w_out = w_ref[r3:r3 + C, :].astype(f32)             # [C, LANE]
    logits = jnp.dot(h2, w_out, preferred_element_type=f32) + b_out  # [n, LANE]
    zmax = jnp.max(logits, axis=-1, keepdims=True)
    z = logits - zmax
    lse = jnp.log(jnp.sum(jnp.exp(z), axis=-1, keepdims=True))
    o_ref[...] = (z - lse).astype(o_ref.dtype)          # full-lane (unmasked) store


# -----------------------------------------------------------------------------
# JAX wrapper / glue (layout packing only; all model compute is in the kernel)
# -----------------------------------------------------------------------------
def gat_model_baseline(x, edge_index, params, *, heads):
    n, in_f = x.shape
    hidden = params["b1"].shape[-1]
    out_f = params["w_out"].shape[1]
    NH = heads * n
    HC = heads * hidden
    f32 = jnp.float32

    assert NH <= LANE and heads * in_f <= LANE
    assert hidden + 2 <= LANE and out_f <= LANE

    # Dense adjacency incl. self loops (PyG add_self_loops=True) as an additive
    # block-diagonal mask bias: 0 where (same head, edge j->i or i==j), else -1e30.
    src, dst = edge_index[0], edge_index[1]
    adj = jnp.zeros((n, n), f32).at[dst, src].set(1.0)
    adj = adj.at[jnp.arange(n), jnp.arange(n)].set(1.0)
    mask_bias = (jnp.kron(jnp.eye(heads, dtype=f32), adj) - 1.0) * 1e30   # [NH, NH]

    def augmented_weight(w, a_src, a_dst, k_pad):
        # head block h (rows) = [W_h | W_h @ a_src_h | W_h @ a_dst_h], zero padded.
        blocks = []
        for h in range(heads):
            wh = w[:, h * hidden:(h + 1) * hidden]                 # [fin, hidden]
            blocks.append(jnp.concatenate(
                [wh, wh @ a_src[h][:, None], wh @ a_dst[h][:, None]], axis=1))
        wa = jnp.concatenate(blocks, axis=0)                       # [heads*fin, hidden+2]
        return jnp.pad(wa, ((0, k_pad - wa.shape[0]), (0, LANE - wa.shape[1])))

    x_blk = jnp.pad(jnp.kron(jnp.eye(heads, dtype=f32), x),
                    ((0, 0), (0, LANE - heads * in_f)))            # [NH, LANE]
    w1_aug = augmented_weight(params["w1"], params["a_src1"], params["a_dst1"], LANE)
    w2_aug = augmented_weight(params["w2"], params["a_src2"], params["a_dst2"], HC)
    w_out = jnp.pad(params["w_out"], ((0, 0), (0, LANE - out_f)))  # [hidden, LANE]

    # Two input DMAs total: one bf16 weight/feature slab, one f32 mask/bias slab.
    w_buf = jnp.concatenate([x_blk, w1_aug, w2_aug, w_out],
                            axis=0).astype(jnp.bfloat16)           # [NH+LANE+HC+hidden, LANE]
    f_buf = jnp.zeros((NH + 24, LANE), f32)
    f_buf = f_buf.at[0:NH, 0:NH].set(mask_bias)
    f_buf = f_buf.at[NH, 0:hidden].set(params["b1"].reshape(-1))
    f_buf = f_buf.at[NH + 8, 0:hidden].set(params["b2"].reshape(-1))
    f_buf = f_buf.at[NH + 16, :].set(
        jnp.full((LANE,), -1e30, f32).at[0:out_f].set(params["b_out"].reshape(-1)))

    vmem = lambda: pl.BlockSpec(memory_space=pltpu.MemorySpace.VMEM)
    out_pad = pl.pallas_call(
        functools.partial(gat_kernel, heads, n, hidden),
        out_shape=jax.ShapeDtypeStruct((n, LANE), f32),
        in_specs=[vmem(), vmem()],
        out_specs=vmem(),
        scratch_shapes=[pltpu.VMEM((NH, HC), jnp.bfloat16)],
    )(w_buf, f_buf)
    return out_pad[:, :out_f]


def init_params(key, in_features, hidden, out_features, heads):
    ks = jax.random.split(key, 8)

    def xavier(k, shape):
        fan_in, fan_out = shape[0], shape[-1]
        lim = (6.0 / (fan_in + fan_out)) ** 0.5
        return jax.random.uniform(k, shape, jnp.float32, -lim, lim)

    return {
        # GATConv lin weight stored [in, heads*out] for x @ W (per-head column blocks).
        "w1":     xavier(ks[0], (in_features, heads * hidden)),
        "a_src1": xavier(ks[1], (heads, hidden)),
        "a_dst1": xavier(ks[2], (heads, hidden)),
        "b1":     jnp.zeros((1, hidden), jnp.float32),
        "w2":     xavier(ks[3], (hidden, heads * hidden)),
        "a_src2": xavier(ks[4], (heads, hidden)),
        "a_dst2": xavier(ks[5], (heads, hidden)),
        "b2":     jnp.zeros((1, hidden), jnp.float32),
        # nn.Linear stores [out, in]; pre-transposed here to [in, out].
        "w_out":  xavier(ks[6], (hidden, out_features)),
        "b_out":  jnp.zeros((1, out_features), jnp.float32),
    }


if __name__ == "__main__":
    # Small, module-consistent shapes (heads * num_nodes == 128 -> lane-dense).
    num_nodes = 16
    in_features = 8
    hidden_channels = 32
    out_features = 8
    heads = 8
    num_edges = 48

    key = jax.random.PRNGKey(0)
    k_x, k_e, k_p = jax.random.split(key, 3)

    x = jax.random.normal(k_x, (num_nodes, in_features), jnp.float32)
    edge_index = jax.random.randint(k_e, (2, num_edges), 0, num_nodes,
                                    dtype=jnp.int32)

    params = init_params(k_p, in_features, hidden_channels, out_features, heads)

    out = gat_model_baseline(x, edge_index, params, heads=heads)
    out = jax.block_until_ready(out)

    assert out.shape == (num_nodes, out_features)
    assert bool(jnp.all(jnp.isfinite(out)))
    # log_softmax rows should exp-sum to ~1.
    assert jnp.allclose(jnp.sum(jnp.exp(out), axis=1), 1.0, atol=1e-3)
    print("KERNEL_OK")
</pallas_src>

<mosaic_0001>
module attributes {stable_mosaic.version = 11 : i64} {
  func.func @gat_kernel(%arg0: memref<544x128xbf16, #tpu.memory_space<vmem>>, %arg1: memref<152x128xf32, #tpu.memory_space<vmem>>, %arg2: memref<16x128xf32, #tpu.memory_space<vmem>>, %arg3: memref<128x256xbf16, #tpu.memory_space<vmem>>) attributes {dimension_semantics = [], scalar_prefetch = 0 : i64, scratch_operands = 1 : i64, tpu.core_type = #tpu.core_type<tc>} {
    %c0 = arith.constant 0 : index
    %c0_0 = arith.constant 0 : index
    %0 = vector.load %arg1[%c0, %c0_0] : memref<152x128xf32, #tpu.memory_space<vmem>>, vector<128x128xf32>
    %c128 = arith.constant 128 : index
    %c0_1 = arith.constant 0 : index
    %1 = vector.load %arg1[%c128, %c0_1] : memref<152x128xf32, #tpu.memory_space<vmem>>, vector<1x32xf32>
    %c136 = arith.constant 136 : index
    %c0_2 = arith.constant 0 : index
    %2 = vector.load %arg1[%c136, %c0_2] : memref<152x128xf32, #tpu.memory_space<vmem>>, vector<1x32xf32>
    %c144 = arith.constant 144 : index
    %c0_3 = arith.constant 0 : index
    %3 = vector.load %arg1[%c144, %c0_3] : memref<152x128xf32, #tpu.memory_space<vmem>>, vector<1x128xf32>
    %c0_4 = arith.constant 0 : index
    %c0_5 = arith.constant 0 : index
    %4 = vector.load %arg0[%c0_4, %c0_5] : memref<544x128xbf16, #tpu.memory_space<vmem>>, vector<128x128xbf16>
    %c128_6 = arith.constant 128 : index
    %c0_7 = arith.constant 0 : index
    %5 = vector.load %arg0[%c128_6, %c0_7] : memref<544x128xbf16, #tpu.memory_space<vmem>>, vector<128x128xbf16>
    %cst = arith.constant dense<0.000000e+00> : vector<128x128xf32>
    %6 = tpu.matmul %4, %5, %cst {dimension_numbers = #tpu.dot_dimension_numbers<[1], [0], [0], [1], [0, 0, 1, 1], [], []>} : vector<128x128xbf16>, vector<128x128xbf16>, vector<128x128xf32> -> vector<128x128xf32>
    %7 = vector.extract_strided_slice %6 {offsets = [0, 32], sizes = [128, 1], strides = [1, 1]} : vector<128x128xf32> to vector<128x1xf32>
    %8 = vector.extract_strided_slice %6 {offsets = [0, 33], sizes = [128, 1], strides = [1, 1]} : vector<128x128xf32> to vector<128x1xf32>
    %9 = tpu.transpose %7, [1, 0] : vector<128x1xf32> -> vector<1x128xf32>
    %10 = vector.broadcast %8 : vector<128x1xf32> to vector<128x128xf32>
    %11 = vector.broadcast %9 : vector<1x128xf32> to vector<128x128xf32>
    %12 = arith.addf %10, %11 : vector<128x128xf32>
    %cst_8 = arith.constant 2.000000e-01 : f32
    %13 = vector.broadcast %cst_8 : f32 to vector<128x128xf32>
    %14 = arith.mulf %13, %12 : vector<128x128xf32>
    %15 = arith.maximumf %12, %14 : vector<128x128xf32>
    %16 = arith.addf %15, %0 : vector<128x128xf32>
    %cst_9 = arith.constant dense<0xFF800000> : vector<128xf32>
    %17 = vector.multi_reduction <maximumf>, %16, %cst_9 [1] : vector<128x128xf32> to vector<128xf32>
    %18 = vector.shape_cast %17 : vector<128xf32> to vector<128x1xf32>
    %19 = vector.broadcast %18 : vector<128x1xf32> to vector<128x128xf32>
    %20 = arith.subf %16, %19 : vector<128x128xf32>
    %21 = math.exp %20 : vector<128x128xf32>
    %cst_10 = arith.constant dense<0.000000e+00> : vector<128xf32>
    %22 = vector.multi_reduction <add>, %21, %cst_10 [1] : vector<128x128xf32> to vector<128xf32>
    %23 = vector.shape_cast %22 : vector<128xf32> to vector<128x1xf32>
    %cst_11 = arith.constant 8.000000e+00 : f32
    %24 = vector.broadcast %cst_11 : f32 to vector<128x1xf32>
    %25 = arith.mulf %23, %24 : vector<128x1xf32>
    %26 = tpu.reciprocal %25 {approx = true} : vector<128x1xf32> -> vector<128x1xf32>
    %27 = vector.broadcast %26 : vector<128x1xf32> to vector<128x128xf32>
    %28 = arith.mulf %21, %27 : vector<128x128xf32>
    %cst_12 = arith.constant dense<0.000000e+00> : vector<128x128xf32>
    %29 = tpu.matmul %28, %6, %cst_12 {dimension_numbers = #tpu.dot_dimension_numbers<[1], [0], [0], [1], [0, 0, 1, 1], [], []>} : vector<128x128xf32>, vector<128x128xf32>, vector<128x128xf32> -> vector<128x128xf32>
    %30 = vector.extract_strided_slice %29 {offsets = [0, 0], sizes = [16, 32], strides = [1, 1]} : vector<128x128xf32> to vector<16x32xf32>
    %31 = vector.extract_strided_slice %29 {offsets = [16, 0], sizes = [16, 32], strides = [1, 1]} : vector<128x128xf32> to vector<16x32xf32>
    %32 = arith.addf %30, %31 : vector<16x32xf32>
    %33 = vector.extract_strided_slice %29 {offsets = [32, 0], sizes = [16, 32], strides = [1, 1]} : vector<128x128xf32> to vector<16x32xf32>
    %34 = arith.addf %32, %33 : vector<16x32xf32>
    %35 = vector.extract_strided_slice %29 {offsets = [48, 0], sizes = [16, 32], strides = [1, 1]} : vector<128x128xf32> to vector<16x32xf32>
    %36 = arith.addf %34, %35 : vector<16x32xf32>
    %37 = vector.extract_strided_slice %29 {offsets = [64, 0], sizes = [16, 32], strides = [1, 1]} : vector<128x128xf32> to vector<16x32xf32>
    %38 = arith.addf %36, %37 : vector<16x32xf32>
    %39 = vector.extract_strided_slice %29 {offsets = [80, 0], sizes = [16, 32], strides = [1, 1]} : vector<128x128xf32> to vector<16x32xf32>
    %40 = arith.addf %38, %39 : vector<16x32xf32>
    %41 = vector.extract_strided_slice %29 {offsets = [96, 0], sizes = [16, 32], strides = [1, 1]} : vector<128x128xf32> to vector<16x32xf32>
    %42 = arith.addf %40, %41 : vector<16x32xf32>
    %43 = vector.extract_strided_slice %29 {offsets = [112, 0], sizes = [16, 32], strides = [1, 1]} : vector<128x128xf32> to vector<16x32xf32>
    %44 = arith.addf %42, %43 : vector<16x32xf32>
    %45 = vector.broadcast %1 : vector<1x32xf32> to vector<16x32xf32>
    %46 = arith.addf %44, %45 : vector<16x32xf32>
    %cst_13 = arith.constant 0.000000e+00 : f32
    %47 = vector.broadcast %cst_13 : f32 to vector<16x32xf32>
    %48 = arith.cmpf ogt, %46, %47 : vector<16x32xf32>
    %cst_14 = arith.constant 0.000000e+00 : f32
    %49 = vector.broadcast %cst_14 : f32 to vector<16x32xf32>
    %50 = arith.minimumf %46, %49 : vector<16x32xf32>
    %51 = math.exp %50 : vector<16x32xf32>
    %cst_15 = arith.constant 1.000000e+00 : f32
    %52 = vector.broadcast %cst_15 : f32 to vector<16x32xf32>
    %53 = arith.subf %51, %52 : vector<16x32xf32>
    %54 = arith.select %48, %46, %53 : vector<16x32xi1>, vector<16x32xf32>
    %cst_16 = arith.constant 0.000000e+00 : bf16
    %55 = vector.broadcast %cst_16 : bf16 to vector<128x256xbf16>
    %c0_17 = arith.constant 0 : index
    %c0_18 = arith.constant 0 : index
    %56 = vector.load %arg3[%c0_17, %c0_18] : memref<128x256xbf16, #tpu.memory_space<vmem>>, vector<128x256xbf16>
    tpu.vector_store %arg3[%c0_17, %c0_18], %55 {strides = array<i32>} : memref<128x256xbf16, #tpu.memory_space<vmem>>, vector<128x256xbf16>,
    %57 = arith.truncf %54 : vector<16x32xf32> to vector<16x32xbf16>
    %c0_19 = arith.constant 0 : index
    %c0_20 = arith.constant 0 : index
    %58 = vector.load %arg3[%c0_19, %c0_20] : memref<128x256xbf16, #tpu.memory_space<vmem>>, vector<16x32xbf16>
    tpu.vector_store %arg3[%c0_19, %c0_20], %57 {strides = array<i32>} : memref<128x256xbf16, #tpu.memory_space<vmem>>, vector<16x32xbf16>,
    %c16 = arith.constant 16 : index
    %c32 = arith.constant 32 : index
    %59 = vector.load %arg3[%c16, %c32] : memref<128x256xbf16, #tpu.memory_space<vmem>>, vector<16x32xbf16>
    tpu.vector_store %arg3[%c16, %c32], %57 {strides = array<i32>} : memref<128x256xbf16, #tpu.memory_space<vmem>>, vector<16x32xbf16>,
    %c32_21 = arith.constant 32 : index
    %c64 = arith.constant 64 : index
    %60 = vector.load %arg3[%c32_21, %c64] : memref<128x256xbf16, #tpu.memory_space<vmem>>, vector<16x32xbf16>
    tpu.vector_store %arg3[%c32_21, %c64], %57 {strides = array<i32>} : memref<128x256xbf16, #tpu.memory_space<vmem>>, vector<16x32xbf16>,
    %c48 = arith.constant 48 : index
    %c96 = arith.constant 96 : index
    %61 = vector.load %arg3[%c48, %c96] : memref<128x256xbf16, #tpu.memory_space<vmem>>, vector<16x32xbf16>
    tpu.vector_store %arg3[%c48, %c96], %57 {strides = array<i32>} : memref<128x256xbf16, #tpu.memory_space<vmem>>, vector<16x32xbf16>,
    %c64_22 = arith.constant 64 : index
    %c128_23 = arith.constant 128 : index
    %62 = vector.load %arg3[%c64_22, %c128_23] : memref<128x256xbf16, #tpu.memory_space<vmem>>, vector<16x32xbf16>
    tpu.vector_store %arg3[%c64_22, %c128_23], %57 {strides = array<i32>} : memref<128x256xbf16, #tpu.memory_space<vmem>>, vector<16x32xbf16>,
    %c80 = arith.constant 80 : index
    %c160 = arith.constant 160 : index
    %63 = vector.load %arg3[%c80, %c160] : memref<128x256xbf16, #tpu.memory_space<vmem>>, vector<16x32xbf16>
    tpu.vector_store %arg3[%c80, %c160], %57 {strides = array<i32>} : memref<128x256xbf16, #tpu.memory_space<vmem>>, vector<16x32xbf16>,
    %c96_24 = arith.constant 96 : index
    %c192 = arith.constant 192 : index
    %64 = vector.load %arg3[%c96_24, %c192] : memref<128x256xbf16, #tpu.memory_space<vmem>>, vector<16x32xbf16>
    tpu.vector_store %arg3[%c96_24, %c192], %57 {strides = array<i32>} : memref<128x256xbf16, #tpu.memory_space<vmem>>, vector<16x32xbf16>,
    %c112 = arith.constant 112 : index
    %c224 = arith.constant 224 : index
    %65 = vector.load %arg3[%c112, %c224] : memref<128x256xbf16, #tpu.memory_space<vmem>>, vector<16x32xbf16>
    tpu.vector_store %arg3[%c112, %c224], %57 {strides = array<i32>} : memref<128x256xbf16, #tpu.memory_space<vmem>>, vector<16x32xbf16>,
    %c0_25 = arith.constant 0 : index
    %c0_26 = arith.constant 0 : index
    %66 = vector.load %arg3[%c0_25, %c0_26] : memref<128x256xbf16, #tpu.memory_space<vmem>>, vector<128x256xbf16>
    %c256 = arith.constant 256 : index
    %c0_27 = arith.constant 0 : index
    %67 = vector.load %arg0[%c256, %c0_27] : memref<544x128xbf16, #tpu.memory_space<vmem>>, vector<256x128xbf16>
    %cst_28 = arith.constant dense<0.000000e+00> : vector<128x128xf32>
    %68 = tpu.matmul %66, %67, %cst_28 {dimension_numbers = #tpu.dot_dimension_numbers<[1], [0], [0], [1], [0, 0, 1, 1], [], []>} : vector<128x256xbf16>, vector<256x128xbf16>, vector<128x128xf32> -> vector<128x128xf32>
    %69 = vector.extract_strided_slice %68 {offsets = [0, 32], sizes = [128, 1], strides = [1, 1]} : vector<128x128xf32> to vector<128x1xf32>
    %70 = vector.extract_strided_slice %68 {offsets = [0, 33], sizes = [128, 1], strides = [1, 1]} : vector<128x128xf32> to vector<128x1xf32>
    %71 = tpu.transpose %69, [1, 0] : vector<128x1xf32> -> vector<1x128xf32>
    %72 = vector.broadcast %70 : vector<128x1xf32> to vector<128x128xf32>
    %73 = vector.broadcast %71 : vector<1x128xf32> to vector<128x128xf32>
    %74 = arith.addf %72, %73 : vector<128x128xf32>
    %cst_29 = arith.constant 2.000000e-01 : f32
    %75 = vector.broadcast %cst_29 : f32 to vector<128x128xf32>
    %76 = arith.mulf %75, %74 : vector<128x128xf32>
    %77 = arith.maximumf %74, %76 : vector<128x128xf32>
    %78 = arith.addf %77, %0 : vector<128x128xf32>
    %cst_30 = arith.constant dense<0xFF800000> : vector<128xf32>
    %79 = vector.multi_reduction <maximumf>, %78, %cst_30 [1] : vector<128x128xf32> to vector<128xf32>
    %80 = vector.shape_cast %79 : vector<128xf32> to vector<128x1xf32>
    %81 = vector.broadcast %80 : vector<128x1xf32> to vector<128x128xf32>
    %82 = arith.subf %78, %81 : vector<128x128xf32>
    %83 = math.exp %82 : vector<128x128xf32>
    %cst_31 = arith.constant dense<0.000000e+00> : vector<128xf32>
    %84 = vector.multi_reduction <add>, %83, %cst_31 [1] : vector<128x128xf32> to vector<128xf32>
    %85 = vector.shape_cast %84 : vector<128xf32> to vector<128x1xf32>
    %cst_32 = arith.constant 8.000000e+00 : f32
    %86 = vector.broadcast %cst_32 : f32 to vector<128x1xf32>
    %87 = arith.mulf %85, %86 : vector<128x1xf32>
    %88 = tpu.reciprocal %87 {approx = true} : vector<128x1xf32> -> vector<128x1xf32>
    %89 = vector.broadcast %88 : vector<128x1xf32> to vector<128x128xf32>
    %90 = arith.mulf %83, %89 : vector<128x128xf32>
    %cst_33 = arith.constant dense<0.000000e+00> : vector<128x128xf32>
    %91 = tpu.matmul %90, %68, %cst_33 {dimension_numbers = #tpu.dot_dimension_numbers<[1], [0], [0], [1], [0, 0, 1, 1], [], []>} : vector<128x128xf32>, vector<128x128xf32>, vector<128x128xf32> -> vector<128x128xf32>
    %92 = vector.extract_strided_slice %91 {offsets = [0, 0], sizes = [16, 32], strides = [1, 1]} : vector<128x128xf32> to vector<16x32xf32>
    %93 = vector.extract_strided_slice %91 {offsets = [16, 0], sizes = [16, 32], strides = [1, 1]} : vector<128x128xf32> to vector<16x32xf32>
    %94 = arith.addf %92, %93 : vector<16x32xf32>
    %95 = vector.extract_strided_slice %91 {offsets = [32, 0], sizes = [16, 32], strides = [1, 1]} : vector<128x128xf32> to vector<16x32xf32>
    %96 = arith.addf %94, %95 : vector<16x32xf32>
    %97 = vector.extract_strided_slice %91 {offsets = [48, 0], sizes = [16, 32], strides = [1, 1]} : vector<128x128xf32> to vector<16x32xf32>
    %98 = arith.addf %96, %97 : vector<16x32xf32>
    %99 = vector.extract_strided_slice %91 {offsets = [64, 0], sizes = [16, 32], strides = [1, 1]} : vector<128x128xf32> to vector<16x32xf32>
    %100 = arith.addf %98, %99 : vector<16x32xf32>
    %101 = vector.extract_strided_slice %91 {offsets = [80, 0], sizes = [16, 32], strides = [1, 1]} : vector<128x128xf32> to vector<16x32xf32>
    %102 = arith.addf %100, %101 : vector<16x32xf32>
    %103 = vector.extract_strided_slice %91 {offsets = [96, 0], sizes = [16, 32], strides = [1, 1]} : vector<128x128xf32> to vector<16x32xf32>
    %104 = arith.addf %102, %103 : vector<16x32xf32>
    %105 = vector.extract_strided_slice %91 {offsets = [112, 0], sizes = [16, 32], strides = [1, 1]} : vector<128x128xf32> to vector<16x32xf32>
    %106 = arith.addf %104, %105 : vector<16x32xf32>
    %107 = vector.broadcast %2 : vector<1x32xf32> to vector<16x32xf32>
    %108 = arith.addf %106, %107 : vector<16x32xf32>
    %cst_34 = arith.constant 0.000000e+00 : f32
    %109 = vector.broadcast %cst_34 : f32 to vector<16x32xf32>
    %110 = arith.cmpf ogt, %108, %109 : vector<16x32xf32>
    %cst_35 = arith.constant 0.000000e+00 : f32
    %111 = vector.broadcast %cst_35 : f32 to vector<16x32xf32>
    %112 = arith.minimumf %108, %111 : vector<16x32xf32>
    %113 = math.exp %112 : vector<16x32xf32>
    %cst_36 = arith.constant 1.000000e+00 : f32
    %114 = vector.broadcast %cst_36 : f32 to vector<16x32xf32>
    %115 = arith.subf %113, %114 : vector<16x32xf32>
    %116 = arith.select %110, %108, %115 : vector<16x32xi1>, vector<16x32xf32>
    %c512 = arith.constant 512 : index
    %c0_37 = arith.constant 0 : index
    %117 = vector.load %arg0[%c512, %c0_37] : memref<544x128xbf16, #tpu.memory_space<vmem>>, vector<32x128xbf16>
    %118 = arith.extf %117 : vector<32x128xbf16> to vector<32x128xf32>
    %cst_38 = arith.constant dense<0.000000e+00> : vector<16x128xf32>
    %119 = tpu.matmul %116, %118, %cst_38 {dimension_numbers = #tpu.dot_dimension_numbers<[1], [0], [0], [1], [0, 0, 1, 1], [], []>} : vector<16x32xf32>, vector<32x128xf32>, vector<16x128xf32> -> vector<16x128xf32>
    %120 = vector.broadcast %3 : vector<1x128xf32> to vector<16x128xf32>
    %121 = arith.addf %119, %120 : vector<16x128xf32>
    %cst_39 = arith.constant dense<0xFF800000> : vector<16xf32>
    %122 = vector.multi_reduction <maximumf>, %121, %cst_39 [1] : vector<16x128xf32> to vector<16xf32>
    %123 = vector.shape_cast %122 : vector<16xf32> to vector<16x1xf32>
    %124 = vector.broadcast %123 : vector<16x1xf32> to vector<16x128xf32>
    %125 = arith.subf %121, %124 : vector<16x128xf32>
    %126 = math.exp %125 : vector<16x128xf32>
    %cst_40 = arith.constant dense<0.000000e+00> : vector<16xf32>
    %127 = vector.multi_reduction <add>, %126, %cst_40 [1] : vector<16x128xf32> to vector<16xf32>
    %128 = vector.shape_cast %127 : vector<16xf32> to vector<16x1xf32>
    %129 = math.log %128 : vector<16x1xf32>
    %130 = vector.broadcast %129 : vector<16x1xf32> to vector<16x128xf32>
    %131 = arith.subf %125, %130 : vector<16x128xf32>
    %c0_41 = arith.constant 0 : index
    %c0_42 = arith.constant 0 : index
    %132 = vector.load %arg2[%c0_41, %c0_42] : memref<16x128xf32, #tpu.memory_space<vmem>>, vector<16x128xf32>
    tpu.vector_store %arg2[%c0_41, %c0_42], %131 {strides = array<i32>} : memref<16x128xf32, #tpu.memory_space<vmem>>, vector<16x128xf32>,
    return
  }
}

</mosaic_0001>

<bundles_post_ra>
// kernel: tpu_custom_call.1
= control target key start
LH: loop header
LB: loop body
LE: loop exit
PB: predicated region body
PF: predicated region fallthrough
CT: control target
= control target key end

     0   :  { %7 = vsyncpa [#allocation4], 0  ;;  %s3017_s0 = inlined_call_operand.hbm [shape: bf16[544,128], index: 0, kind: input, shape index: {}]   ;;  %s3018_s1 = inlined_call_operand.hbm [shape: f32[152,128], index: 1, kind: input, shape index: {}]   ;;  %s3019_s2 = inlined_call_operand.hbm [shape: f32[16,128], index: 2, kind: output, shape index: {}]  }
   0x1   :  { %8 = vsyncpa [#allocation7], 0 }
   0x2   :  { %9 = vsyncpa [#allocation5], 0  ;;  %s2560_s9 = smov [#allocation3]   ;;  %s2488_s13 = scalar_lea.hbm %s3017_s0, 4352 }
   0x3   :  { %s15_s10 = sshll.u32 %s2560_s9, 4  ;;  %p2489_p0 = scmp.ne.s32.totalorder %s3017_s0, %s2488_s13  ;;  %s16_s10 = int_to_ptr.vmem [resolvable:$true] %s15_s10 }
   0x4   :  { %p2492_p1 = scmp.lt.u32.totalorder %s2488_s13, %s3017_s0 }
   0x6   :  { %p2494_p2 = pnand %p2492_p1, %p2489_p0 }
   0x8   :  { %2497 = shalt.err (!%p2494_p2)
}
   0x9   :  { %s2498_s18 = scalar_lea.vmem %s16_s10, 4352  ;;  %p2503_p4 = scmp.lt.s32.totalorder %s16_s10, %s16_s10 }
   0xa   :  { %p2499_p3 = scmp.ne.s32.totalorder %s16_s10, %s2498_s18  ;;  %p2504_p5 = scmp.lt.s32.totalorder %s2498_s18, %s2498_s18 }
   0xc   :  { %p2505_p6 = por %p2504_p5, %p2503_p4 }
   0xe   :  { %p2506_p7 = pnand %p2505_p6, %p2499_p3 }
  0x10   :  { %2509 = shalt.err (!%p2506_p7)
}
  0x11   :  { %s2561_s19 = smov 64   ;;  %s2562_s20 = smov 4  }
  0x12   :  { %21 = dma.hbm_to_vmem [thread:$0]  %s3017_s0, 4352, %s16_s10, [#allocation4], %s2561_s19, %s2561_s19, %s2562_s20  }
  0x13   :  { %s2563_s23 = smov [#allocation6]   ;;  %s2510_s27 = scalar_lea.hbm %s3018_s1, 2432 }
  0x14   :  { %s27_s24 = sshll.u32 %s2563_s23, 4  ;;  %p2511_p8 = scmp.ne.s32.totalorder %s3018_s1, %s2510_s27  ;;  %s28_s24 = int_to_ptr.vmem [resolvable:$true] %s27_s24 }
  0x15   :  { %p2514_p9 = scmp.lt.u32.totalorder %s2510_s27, %s3018_s1 }
  0x17   :  { %p2516_p10 = pnand %p2514_p9, %p2511_p8 }
  0x19   :  { %2519 = shalt.err (!%p2516_p10)
}
  0x1a   :  { %s2520_s4 = scalar_lea.vmem %s28_s24, 2432  ;;  %p2525_p12 = scmp.lt.s32.totalorder %s28_s24, %s28_s24 }
  0x1b   :  { %p2521_p11 = scmp.ne.s32.totalorder %s28_s24, %s2520_s4  ;;  %p2526_p13 = scmp.lt.s32.totalorder %s2520_s4, %s2520_s4 }
  0x1d   :  { %p2527_p0 = por %p2526_p13, %p2525_p12 }
  0x1f   :  { %p2528_p1 = pnand %p2527_p0, %p2521_p11 }
  0x21   :  { %2531 = shalt.err (!%p2528_p1)
}
  0x22   :  { %s2564_s0 = smov 128   ;;  %s2565_s5 = smov 8  }
  0x23   :  { %33 = dma.hbm_to_vmem [thread:$0]  %s3018_s1, 2432, %s28_s24, [#allocation7], %s2564_s0, %s2564_s0, %s2565_s5  }
  0x24   :  { %2554 = dma.done.wait [#allocation4], 4352  }
  0x25   :  { %2555 = vsyncadd [#allocation4], 4294962944 }
  0x26   :  { %2556 = dma.done.wait [#allocation7], 2432  }
  0x27   :  { %2557 = vsyncadd [#allocation7], 4294964864  ;;  %v2297_v0 = vld [vmem:[#allocation3 + $0x40] sm:$0xff]   ;;  %v2298_v1 = vld [vmem:[#allocation3 + $0x48] sm:$0xff]   ;;  %v2566_v16 = vmov 33   ;;  %s2567_s1 = smov 96  }
  0x28   :  { %2029 = vmatprep.subr.bf16.mxu0 %v2297_v0  ;;  %v2299_v2 = vld [vmem:[#allocation3 + $0x50] sm:$0xff]   ;;  %v2300_v3 = vld [vmem:[#allocation3 + $0x58] sm:$0xff]   ;;  %v2305_v4 = vld [vmem:[#allocation3] sm:$0xff]   ;;  %2296 = vset.pattern.permute.xlu1 %v2566_v16  ;;  %vm867_vm2 = vcmask 261120   ;;  %s2569_s8 = smov 32   ;;  %vm878_vm3 = vcmask 785920  }
  0x29   :  { %2030 = vmatpush3.bf16.msra.mxu0 %v2297_v0  ;;  %2045 = vmatprep.mubr.bf16.mxu0 %v2305_v4  ;;  %v2301_v5 = vld [vmem:[#allocation3 + $0x60] sm:$0xff]   ;;  %v2302_v6 = vld [vmem:[#allocation3 + $0x68] sm:$0xff]   ;;  %v2303_v7 = vld [vmem:[#allocation3 + $0x70] sm:$0xff]   ;;  %vm873_vm4 = vcmask 523520   ;;  %vm883_vm5 = vcmask 1048320   ;;  %s2570_s9 = smov [#allocation8]  }
  0x2a   :  { %2031 = vmatprep.subr.bf16.mxu0 %v2298_v1  ;;  %v2304_v8 = vld [vmem:[#allocation3 + $0x78] sm:$0xff]   ;;  %v2306_v9 = vld [vmem:[#allocation3 + $0x8] sm:$0xff]   ;;  %v2307_v10 = vld [vmem:[#allocation3 + $0x10] sm:$0xff]   ;;  %2295 = vset.pattern.permute.xlu0 %v2566_v16  ;;  %s1815_s10 = sshll.u32 %s2570_s9, 4  ;;  %s1816_s10 = int_to_ptr.vmem [resolvable:$true] %s1815_s10 }
  0x2b   :  { %v2308_v11 = vld [vmem:[#allocation3 + $0x18] sm:$0xff]   ;;  %v2309_v12 = vld [vmem:[#allocation3 + $0x20] sm:$0xff]   ;;  %v2310_v13 = vld [vmem:[#allocation3 + $0x28] sm:$0xff]   ;;  %s2532_s11 = scalar_lea.vmem %s1816_s10, 256  ;;  %p2537_p3 = scmp.lt.s32.totalorder %s1816_s10, %s1816_s10 }
  0x2c   :  { %v2311_v14 = vld [vmem:[#allocation3 + $0x30] sm:$0xff]   ;;  %v2312_v15 = vld [vmem:[#allocation3 + $0x38] sm:$0xff]   ;;  %v51_v16 = vld [vmem:[#allocation6 + $0x50] sm:$0xff]  ;;  %p2533_p2 = scmp.ne.s32.totalorder %s1816_s10, %s2532_s11  ;;  %p2538_p4 = scmp.lt.s32.totalorder %s2532_s11, %s2532_s11 }
  0x2d   :  { %2032 = vmatpush3.bf16.msra.mxu0 %v2298_v1  ;;  %v445_v1 = vlaneseq }
  0x2e   :  { %2033 = vmatprep.subr.bf16.mxu0 %v2299_v2  ;;  %p2539_p5 = por %p2538_p4, %p2537_p3 }
  0x30   :  { %p2540_p6 = pnand %p2539_p5, %p2533_p2 }
  0x31   :  { %2034 = vmatpush3.bf16.msra.mxu0 %v2299_v2 }
  0x32   :  { %2035 = vmatprep.subr.bf16.mxu0 %v2300_v3 }
  0x35   :  { %2036 = vmatpush3.bf16.msra.mxu0 %v2300_v3  ;;  %v2631_v3 = vshrl.u32 %v445_v1, 7 }
  0x36   :  { %2037 = vmatprep.subr.bf16.mxu0 %v2301_v5 }
  0x39   :  { %2038 = vmatpush3.bf16.msra.mxu0 %v2301_v5  ;;  %v447_v5 = vsub.s32 0, %v2631_v3 }
  0x3a   :  { %2039 = vmatprep.subr.bf16.mxu0 %v2302_v6 }
  0x3d   :  { %2040 = vmatpush3.bf16.msra.mxu0 %v2302_v6 }
  0x3e   :  { %2041 = vmatprep.subr.bf16.mxu0 %v2303_v7 }
  0x41   :  { %2042 = vmatpush3.bf16.msra.mxu0 %v2303_v7 }
  0x42   :  { %2043 = vmatprep.subr.bf16.mxu0 %v2304_v8 }
  0x45   :  { %2044 = vmatpush3.bf16.msra.mxu0 %v2304_v8 }
  0x48   :  { %2046 = vmatmul.mubr.bf16.vlgmr.msra.gmra.mrb[0].mxu0 %v2306_v9 }
  0x49   :  { %2049 = vmatprep.mubr.bf16.mxu0 %v2307_v10 }
  0x50   :  { %2050 = vmatmul.mubr.bf16.gmra.mrb[4].mxu0 %v2308_v11 }
  0x51   :  { %2053 = vmatprep.mubr.bf16.mxu0 %v2309_v12 }
  0x58   :  { %2054 = vmatmul.mubr.bf16.gmra.mrb[8].mxu0 %v2310_v13 }
  0x59   :  { %2057 = vmatprep.mubr.bf16.mxu0 %v2311_v14 }
  0x60   :  { %2058 = vmatmul.mubr.bf16.gmra.mrb[12].mxu0 %v2312_v15 }
 0x11b   :  { %v2047_v17 = vpop.f32.mrb[0].mxu0 }
 0x11c   :  { %305 = vrot.lane.b32.xlu1 %v2047_v17, %s2567_s1  ;;  %v222_v18 = vpop.f32.mrb[1].mxu0 }
 0x11d   :  { %301 = vrot.lane.b32.xlu0 %v222_v18, %s2567_s1  ;;  %v2048_v19 = vpop.f32.mrb[2].mxu0 }
 0x11e   :  { %v2188_v20 = vpack.c.bf16 %v2048_v19, %v2047_v17  ;;  %v225_v21 = vpop.f32.mrb[3].mxu0 }
 0x11f   :  { %v2184_v22 = vpack.c.bf16 %v225_v21, %v222_v18 }
 0x120   :  { %307 = vrot.lane.b32.xlu1 %v2048_v19, %s2567_s1 }
 0x121   :  { %303 = vrot.lane.b32.xlu0 %v225_v21, %s2567_s1  ;;  %2185 = vmatprep.subr.bf16.mxu1 %v2184_v22 }
 0x122   :  { %2187 = vmatpush3.bf16.msra.mxu1 %v2184_v22 }
 0x123   :  { %v2051_v23 = vpop.f32.mrb[4].mxu0  ;;  %2189 = vmatprep.subr.bf16.mxu1 %v2188_v20 }
 0x124   :  { %v238_v24 = vpop.f32.mrb[5].mxu0 }
 0x125   :  { %309 = vrot.lane.b32.xlu0 %v238_v24, %s2567_s1  ;;  %v2052_v25 = vpop.f32.mrb[6].mxu0 }
 0x126   :  { %v2196_v26 = vpack.c.bf16 %v2052_v25, %v2051_v23  ;;  %2191 = vmatpush3.bf16.msra.mxu1 %v2188_v20  ;;  %315 = vrot.lane.b32.xlu1 %v2052_v25, %s2567_s1  ;;  %v241_v27 = vpop.f32.mrb[7].mxu0 }
 0x127   :  { %v2192_v28 = vpack.c.bf16 %v241_v27, %v238_v24 }
 0x129   :  { %313 = vrot.lane.b32.xlu0 %v2051_v23, %s2567_s1  ;;  %2193 = vmatprep.subr.bf16.mxu1 %v2192_v28 }
 0x12a   :  { %311 = vrot.lane.b32.xlu1 %v241_v27, %s2567_s1  ;;  %2195 = vmatpush3.bf16.msra.mxu1 %v2192_v28 }
 0x12b   :  { %v2055_v29 = vpop.f32.mrb[8].mxu0  ;;  %2197 = vmatprep.subr.bf16.mxu1 %v2196_v26 }
 0x12c   :  { %v254_v30 = vpop.f32.mrb[9].mxu0 }
 0x12d   :  { %317 = vrot.lane.b32.xlu0 %v254_v30, %s2567_s1  ;;  %v2056_v31 = vpop.f32.mrb[10].mxu0 }
 0x12e   :  { %v2204_v32 = vpack.c.bf16 %v2056_v31, %v2055_v29  ;;  %2199 = vmatpush3.bf16.msra.mxu1 %v2196_v26  ;;  %323 = vrot.lane.b32.xlu1 %v2056_v31, %s2567_s1  ;;  %v257_v33 = vpop.f32.mrb[11].mxu0 }
 0x12f   :  { %v2200_v34 = vpack.c.bf16 %v257_v33, %v254_v30 }
 0x131   :  { %321 = vrot.lane.b32.xlu0 %v2055_v29, %s2567_s1  ;;  %2201 = vmatprep.subr.bf16.mxu1 %v2200_v34 }
 0x132   :  { %319 = vrot.lane.b32.xlu1 %v257_v33, %s2567_s1  ;;  %2203 = vmatpush3.bf16.msra.mxu1 %v2200_v34 }
 0x133   :  { %v2059_v35 = vpop.f32.mrb[12].mxu0  ;;  %2205 = vmatprep.subr.bf16.mxu1 %v2204_v32 }
 0x134   :  { %v270_v36 = vpop.f32.mrb[13].mxu0 }
 0x135   :  { %325 = vrot.lane.b32.xlu0 %v270_v36, %s2567_s1  ;;  %v2060_v37 = vpop.f32.mrb[14].mxu0 }
 0x136   :  { %386 = vperm.xlu1 %2296, %v225_v21   ;;  %2207 = vmatpush3.bf16.msra.mxu1 %v2204_v32  ;;  %v2212_v38 = vpack.c.bf16 %v2060_v37, %v2059_v35  ;;  %v273_v39 = vpop.f32.mrb[15].mxu0 }
 0x137   :  { %v2208_v40 = vpack.c.bf16 %v273_v39, %v270_v36 }
 0x139   :  { %329 = vrot.lane.b32.xlu0 %v2059_v35, %s2567_s1  ;;  %2209 = vmatprep.subr.bf16.mxu1 %v2208_v40 }
 0x13a   :  { %390 = vperm.xlu1 %2296, %v2047_v17   ;;  %2211 = vmatpush3.bf16.msra.mxu1 %v2208_v40  ;;  %v41_v17 = vld [vmem:[#allocation6] sm:$0xff] }
 0x13b   :  { %2213 = vmatprep.subr.bf16.mxu1 %v2212_v38  ;;  %v45_v40 = vld [vmem:[#allocation6 + $0x20] sm:$0xff] }
 0x13d   :  { %382 = vperm.xlu0 %2295, %v222_v18  }
 0x13e   :  { %398 = vperm.xlu1 %2296, %v238_v24   ;;  %2215 = vmatpush3.bf16.msra.mxu1 %v2212_v38 }
 0x141   :  { %394 = vperm.xlu0 %2295, %v2048_v19  }
 0x142   :  { %406 = vperm.xlu1 %2296, %v2051_v23  }
 0x145   :  { %402 = vperm.xlu0 %2295, %v241_v27  }
 0x146   :  { %331 = vrot.lane.b32.xlu1 %v2060_v37, %s2567_s1 }
 0x149   :  { %410 = vperm.xlu0 %2295, %v2052_v25   ;;  %v42_v25 = vld [vmem:[#allocation6 + $0x8] sm:$0xff] }
 0x14a   :  { %327 = vrot.lane.b32.xlu1 %v273_v39, %s2567_s1 }
 0x14d   :  { %414 = vperm.xlu0 %2295, %v254_v30   ;;  %v43_v30 = vld [vmem:[#allocation6 + $0x10] sm:$0xff] }
 0x151   :  { %418 = vperm.xlu0 %2295, %v257_v33  }
 0x155   :  { %422 = vperm.xlu0 %2295, %v2055_v29  }
 0x159   :  { %426 = vperm.xlu0 %2295, %v2056_v31  }
 0x15d   :  { %430 = vperm.xlu0 %2295, %v270_v36  }
 0x161   :  { %434 = vperm.xlu0 %2295, %v273_v39  }
 0x165   :  { %438 = vperm.xlu0 %2295, %v2059_v35   ;;  %v44_v35 = vld [vmem:[#allocation6 + $0x18] sm:$0xff] }
 0x169   :  { %442 = vperm.xlu0 %2295, %v2060_v37  }
 0x18e   :  { %v306_v42 = vpop.permute.xlu1 %305 }
 0x18f   :  { %v302_v41 = vpop.permute.xlu0 %301 }
 0x190   :  { %349 = vxpose.xlu1.b32.start [1/16] (narrow) %v302_v41, 8 }
 0x192   :  { %v308_v44 = vpop.permute.xlu1 %307 }
 0x193   :  { %v304_v43 = vpop.permute.xlu0 %303 }
 0x194   :  { %350 = vxpose.xlu1.b32.cont [2/16] (narrow) %v304_v43, 8 }
 0x197   :  { %v310_v46 = vpop.permute.xlu0 %309 }
 0x198   :  { %351 = vxpose.xlu1.b32.cont [3/16] (narrow) %v306_v42, 8  ;;  %v316_v45 = vpop.permute.xlu1 %315 }
 0x19b   :  { %v314_v48 = vpop.permute.xlu0 %313 }
 0x19c   :  { %352 = vxpose.xlu1.b32.cont [4/16] (narrow) %v308_v44, 8  ;;  %v312_v47 = vpop.permute.xlu1 %311 }
 0x19f   :  { %v318_v50 = vpop.permute.xlu0 %317 }
 0x1a0   :  { %353 = vxpose.xlu1.b32.cont [5/16] (narrow) %v310_v46, 8  ;;  %v324_v49 = vpop.permute.xlu1 %323 }
 0x1a3   :  { %v322_v53 = vpop.permute.xlu0 %321 }
 0x1a4   :  { %354 = vxpose.xlu1.b32.cont [6/16] (narrow) %v312_v47, 8  ;;  %v320_v51 = vpop.permute.xlu1 %319 }
 0x1a7   :  { %v326_v56 = vpop.permute.xlu0 %325 }
 0x1a8   :  { %355 = vxpose.xlu1.b32.cont [7/16] (narrow) %v314_v48, 8 }
 0x1ab   :  { %v330_v60 = vpop.permute.xlu0 %329 }
 0x1ac   :  { %356 = vxpose.xlu1.b32.cont [8/16] (narrow) %v316_v45, 8  ;;  %v46_v45 = vld [vmem:[#allocation6 + $0x28] sm:$0xff] }
 0x1b0   :  { %357 = vxpose.xlu1.b32.cont [9/16] (narrow) %v318_v50, 8 }
 0x1b4   :  { %358 = vxpose.xlu1.b32.cont [10/16] (narrow) %v320_v51, 8  ;;  %v47_v51 = vld [vmem:[#allocation6 + $0x30] sm:$0xff] }
 0x1b5   :  { %v387_v52 = vpop.permute.xlu1 %386 }
 0x1b8   :  { %359 = vxpose.xlu1.b32.cont [11/16] (narrow) %v322_v53, 8 }
 0x1b9   :  { %v391_v54 = vpop.permute.xlu1 %390 }
 0x1bc   :  { %360 = vxpose.xlu1.b32.cont [12/16] (narrow) %v324_v49, 8  ;;  %v383_v61 = vpop.permute.xlu0 %382 }
 0x1bd   :  { %v399_v55 = vpop.permute.xlu1 %398 }
 0x1c0   :  { %361 = vxpose.xlu1.b32.cont [13/16] (narrow) %v326_v56, 8  ;;  %v395_v62 = vpop.permute.xlu0 %394 }
 0x1c1   :  { %v407_v57 = vpop.permute.xlu1 %406 }
 0x1c4   :  { %v403_v63 = vpop.permute.xlu0 %402 }
 0x1c5   :  { %v332_v58 = vpop.permute.xlu1 %331 }
 0x1c8   :  { %v411_v0 = vpop.permute.xlu0 %410 }
 0x1c9   :  { %v328_v59 = vpop.permute.xlu1 %327 }
 0x1ca   :  { %362 = vxpose.xlu1.b32.cont [14/16] (narrow) %v328_v59, 8 }
 0x1cc   :  { %v415_v2 = vpop.permute.xlu0 %414 }
 0x1ce   :  { %363 = vxpose.xlu1.b32.cont [15/16] (narrow) %v330_v60, 8 }
 0x1d0   :  { %v419_v4 = vpop.permute.xlu0 %418 }
 0x1d2   :  { %364 = vxpose.xlu1.b32.end [16/16] (narrow) %v332_v58, 8 }
 0x1d4   :  { %v423_v8 = vpop.permute.xlu0 %422 }
 0x1d8   :  { %v427_v46 = vpop.permute.xlu0 %426 }
 0x1dc   :  { %v431_v56 = vpop.permute.xlu0 %430 }
 0x216   :  { %v365_v6 = vpop.trf.xlu1 }
 0x217   :  { %v2636_v7 = vrot.slane %v365_v6, %v447_v5  ;;  %v50_v6 = vld [vmem:[#allocation6 + $0x48] sm:$0xff] }
 0x219   :  { %v459_v9 = vadd.f32 %v2636_v7, %v423_v8  ;;  %v449_v10 = vadd.f32 %v2636_v7, %v383_v61  ;;  %v450_v11 = vadd.f32 %v2636_v7, %v387_v52  ;;  %v451_v15 = vadd.f32 %v2636_v7, %v391_v54 }
 0x21a   :  { %v452_v20 = vadd.f32 %v2636_v7, %v395_v62  ;;  %v453_v29 = vadd.f32 %v2636_v7, %v399_v55  ;;  %v454_v34 = vadd.f32 %v2636_v7, %v403_v63  ;;  %v455_v39 = vadd.f32 %v2636_v7, %v407_v57  ;;  %v2672_v57 = vld [vmem:[#allocation6 + $0x38] sm:$0xff]  ;;  %v49_v62 = vld [vmem:[#allocation6 + $0x40] sm:$0xff]  ;;  %v435_v63 = vpop.permute.xlu0 %434 }
 0x21b   :  { %v475_v12 = vmul.f32 0.2, %v459_v9  ;;  %v465_v13 = vmul.f32 0.2, %v449_v10  ;;  %v466_v14 = vmul.f32 0.2, %v450_v11  ;;  %v456_v44 = vadd.f32 %v2636_v7, %v411_v0 }
 0x21c   :  { %v467_v24 = vmul.f32 0.2, %v451_v15  ;;  %v468_v28 = vmul.f32 0.2, %v452_v20  ;;  %v469_v33 = vmul.f32 0.2, %v453_v29  ;;  %v457_v50 = vadd.f32 %v2636_v7, %v415_v2 }
 0x21d   :  { %v491_v18 = vmax.f32 %v459_v9, %v475_v12  ;;  %v481_v19 = vmax.f32 %v449_v10, %v465_v13  ;;  %v482_v23 = vmax.f32 %v450_v11, %v466_v14  ;;  %v470_v38 = vmul.f32 0.2, %v454_v34  ;;  %v52_v13 = vld [vmem:[#allocation6 + $0x58] sm:$0xff] }
 0x21e   :  { %v483_v27 = vmax.f32 %v451_v15, %v467_v24  ;;  %v484_v32 = vmax.f32 %v452_v20, %v468_v28  ;;  %v485_v37 = vmax.f32 %v453_v29, %v469_v33  ;;  %v471_v43 = vmul.f32 0.2, %v455_v39  ;;  %v439_v12 = vpop.permute.xlu0 %438 }
 0x21f   :  { %v2643_v21 = vadd.f32 %v491_v18, %v51_v16  ;;  %v2645_v22 = vadd.f32 %v481_v19, %v41_v17  ;;  %v2649_v26 = vadd.f32 %v482_v23, %v42_v25  ;;  %v486_v42 = vmax.f32 %v454_v34, %v470_v38  ;;  %v53_v18 = vld [vmem:[#allocation6 + $0x60] sm:$0xff] }
 0x220   :  { %v2653_v31 = vadd.f32 %v483_v27, %v43_v30  ;;  %v2657_v36 = vadd.f32 %v484_v32, %v44_v35  ;;  %v2661_v41 = vadd.f32 %v485_v37, %v45_v40  ;;  %v487_v48 = vmax.f32 %v455_v39, %v471_v43  ;;  %v54_v27 = vld [vmem:[#allocation6 + $0x68] sm:$0xff]  ;;  %v55_v32 = vld [vmem:[#allocation6 + $0x70] sm:$0xff]  ;;  %v56_v35 = vld [vmem:[#allocation6 + $0x78] sm:$0xff] }
 0x221   :  { %533 = vmax.xlane.f32.xlu1 %v2643_v21  ;;  %513 = vmax.xlane.f32.xlu0 %v2645_v22  ;;  %v2665_v47 = vadd.f32 %v486_v42, %v46_v45  ;;  %v472_v49 = vmul.f32 0.2, %v456_v44  ;;  %v473_v54 = vmul.f32 0.2, %v457_v50  ;;  %v458_v55 = vadd.f32 %v2636_v7, %v419_v4 }
 0x222   :  { %v2669_v52 = vadd.f32 %v487_v48, %v47_v51  ;;  %v460_v61 = vadd.f32 %v2636_v7, %v427_v46  ;;  %v461_v4 = vadd.f32 %v2636_v7, %v431_v56  ;;  %v462_v11 = vadd.f32 %v2636_v7, %v435_v63  ;;  %v443_v19 = vpop.permute.xlu0 %442 }
 0x223   :  { %v488_v53 = vmax.f32 %v456_v44, %v472_v49  ;;  %v489_v59 = vmax.f32 %v457_v50, %v473_v54  ;;  %v474_v60 = vmul.f32 0.2, %v458_v55  ;;  %v463_v17 = vadd.f32 %v2636_v7, %v439_v12 }
 0x224   :  { %v476_v2 = vmul.f32 0.2, %v460_v61  ;;  %v477_v10 = vmul.f32 0.2, %v461_v4  ;;  %v478_v16 = vmul.f32 0.2, %v462_v11  ;;  %v464_v25 = vadd.f32 %v2636_v7, %v443_v19 }
 0x225   :  { %515 = vmax.xlane.f32.xlu0 %v2649_v26  ;;  %v2676_v58 = vadd.f32 %v488_v53, %v2672_v57  ;;  %v2680_v0 = vadd.f32 %v489_v59, %v49_v62  ;;  %v490_v1 = vmax.f32 %v458_v55, %v474_v60  ;;  %v479_v24 = vmul.f32 0.2, %v463_v17 }
 0x226   :  { %v492_v9 = vmax.f32 %v460_v61, %v476_v2  ;;  %v493_v15 = vmax.f32 %v461_v4, %v477_v10  ;;  %v494_v23 = vmax.f32 %v462_v11, %v478_v16  ;;  %v480_v30 = vmul.f32 0.2, %v464_v25 }
 0x227   :  { %v2684_v8 = vadd.f32 %v490_v1, %v50_v6  ;;  %v495_v29 = vmax.f32 %v463_v17, %v479_v24 }
 0x228   :  { %v2688_v14 = vadd.f32 %v492_v9, %v52_v13  ;;  %v2692_v20 = vadd.f32 %v493_v15, %v53_v18  ;;  %v2696_v28 = vadd.f32 %v494_v23, %v54_v27  ;;  %v496_v34 = vmax.f32 %v464_v25, %v480_v30 }
 0x229   :  { %517 = vmax.xlane.f32.xlu0 %v2653_v31  ;;  %v2699_v33 = vadd.f32 %v495_v29, %v55_v32 }
 0x22a   :  { %v2702_v37 = vadd.f32 %v496_v34, %v56_v35 }
 0x22d   :  { %519 = vmax.xlane.f32.xlu0 %v2657_v36 }
 0x231   :  { %521 = vmax.xlane.f32.xlu0 %v2661_v41 }
 0x235   :  { %523 = vmax.xlane.f32.xlu0 %v2665_v47 }
 0x239   :  { %525 = vmax.xlane.f32.xlu0 %v2669_v52 }
 0x23d   :  { %527 = vmax.xlane.f32.xlu0 %v2676_v58 }
 0x241   :  { %529 = vmax.xlane.f32.xlu0 %v2680_v0 }
 0x245   :  { %531 = vmax.xlane.f32.xlu0 %v2684_v8 }
 0x249   :  { %535 = vmax.xlane.f32.xlu0 %v2688_v14 }
 0x24d   :  { %537 = vmax.xlane.f32.xlu0 %v2692_v20 }
 0x251   :  { %539 = vmax.xlane.f32.xlu0 %v2696_v28 }
 0x255   :  { %541 = vmax.xlane.f32.xlu0 %v2699_v33 }
 0x259   :  { %543 = vmax.xlane.f32.xlu0 %v2702_v37 }
 0x2ae   :  { %v514_v7 = vpop.xlane.xlu0 %513  ;;  %v534_v63 = vpop.xlane.xlu1 %533 }
 0x2af   :  { %v545_v38 = vsub.f32 %v2645_v22, %v514_v7  ;;  %v555_v4 = vsub.f32 %v2643_v21, %v534_v63 }
 0x2b1   :  { %v561_v39 = vmul.f32 1.442695, %v545_v38  ;;  %v581_v11 = vmul.f32 1.442695, %v555_v4 }
 0x2b2   :  { %v516_v40 = vpop.xlane.xlu0 %515 }
 0x2b3   :  { %v546_v42 = vsub.f32 %v2649_v26, %v516_v40  ;;  %2329 = vpow2.f32 %v561_v39 }
 0x2b5   :  { %v563_v43 = vmul.f32 1.442695, %v546_v42 }
 0x2b6   :  { %v518_v44 = vpop.xlane.xlu0 %517 }
 0x2b7   :  { %2331 = vpow2.f32 %v563_v43  ;;  %v547_v45 = vsub.f32 %v2653_v31, %v518_v44 }
 0x2b9   :  { %v565_v46 = vmul.f32 1.442695, %v547_v45 }
 0x2ba   :  { %v520_v48 = vpop.xlane.xlu0 %519 }
 0x2bb   :  { %2333 = vpow2.f32 %v565_v46  ;;  %v548_v49 = vsub.f32 %v2657_v36, %v520_v48 }
 0x2bd   :  { %v567_v50 = vmul.f32 1.442695, %v548_v49  ;;  %v2709_v51 = vpop.eup %2329 }
 0x2be   :  { %v522_v53 = vpop.xlane.xlu0 %521  ;;  %593 = vadd.xlane.f32.xlu0 %v2709_v51 }
 0x2bf   :  { %2335 = vpow2.f32 %v567_v50  ;;  %v549_v22 = vsub.f32 %v2661_v41, %v522_v53 }
 0x2c1   :  { %v2713_v26 = vpop.eup %2331  ;;  %v569_v54 = vmul.f32 1.442695, %v549_v22 }
 0x2c2   :  { %v524_v55 = vpop.xlane.xlu0 %523  ;;  %595 = vadd.xlane.f32.xlu0 %v2713_v26 }
 0x2c3   :  { %2337 = vpow2.f32 %v569_v54  ;;  %v550_v31 = vsub.f32 %v2665_v47, %v524_v55 }
 0x2c5   :  { %v2717_v56 = vpop.eup %2333  ;;  %v571_v36 = vmul.f32 1.442695, %v550_v31 }
 0x2c6   :  { %v526_v59 = vpop.xlane.xlu0 %525  ;;  %597 = vadd.xlane.f32.xlu0 %v2717_v56 }
 0x2c7   :  { %2339 = vpow2.f32 %v571_v36  ;;  %v551_v60 = vsub.f32 %v2669_v52, %v526_v59 }
 0x2c9   :  { %v2721_v61 = vpop.eup %2335  ;;  %v573_v41 = vmul.f32 1.442695, %v551_v60 }
 0x2ca   :  { %v528_v62 = vpop.xlane.xlu0 %527  ;;  %599 = vadd.xlane.f32.xlu0 %v2721_v61 }
 0x2cb   :  { %2341 = vpow2.f32 %v573_v41  ;;  %v552_v1 = vsub.f32 %v2676_v58, %v528_v62 }
 0x2cd   :  { %v2725_v47 = vpop.eup %2337  ;;  %v575_v2 = vmul.f32 1.442695, %v552_v1 }
 0x2ce   :  { %v530_v6 = vpop.xlane.xlu0 %529  ;;  %601 = vadd.xlane.f32.xlu0 %v2725_v47 }
 0x2cf   :  { %2343 = vpow2.f32 %v575_v2  ;;  %v553_v52 = vsub.f32 %v2680_v0, %v530_v6 }
 0x2d1   :  { %v2730_v9 = vpop.eup %2339  ;;  %v577_v10 = vmul.f32 1.442695, %v553_v52 }
 0x2d2   :  { %603 = vadd.xlane.f32.xlu1 %v2730_v9  ;;  %v532_v12 = vpop.xlane.xlu0 %531 }
 0x2d3   :  { %2345 = vpow2.f32 %v577_v10  ;;  %v554_v58 = vsub.f32 %v2684_v8, %v532_v12 }
 0x2d4   :  { %2347 = vpow2.f32 %v581_v11 }
 0x2d5   :  { %v2734_v13 = vpop.eup %2341  ;;  %v579_v15 = vmul.f32 1.442695, %v554_v58 }
 0x2d6   :  { %605 = vadd.xlane.f32.xlu0 %v2734_v13  ;;  %v536_v21 = vpop.xlane.xlu0 %535 }
 0x2d7   :  { %2349 = vpow2.f32 %v579_v15  ;;  %v556_v0 = vsub.f32 %v2688_v14, %v536_v21 }
 0x2d9   :  { %v2738_v16 = vpop.eup %2343  ;;  %v583_v17 = vmul.f32 1.442695, %v556_v0 }
 0x2da   :  { %607 = vadd.xlane.f32.xlu1 %v2738_v16  ;;  %v538_v18 = vpop.xlane.xlu0 %537 }
 0x2db   :  { %2351 = vpow2.f32 %v583_v17  ;;  %v557_v19 = vsub.f32 %v2692_v20, %v538_v18 }
 0x2dd   :  { %v2742_v8 = vpop.eup %2345  ;;  %v585_v23 = vmul.f32 1.442695, %v557_v19 }
 0x2de   :  { %609 = vadd.xlane.f32.xlu0 %v2742_v8  ;;  %v540_v24 = vpop.xlane.xlu0 %539  ;;  %v2746_v27 = vpop.eup %2347 }
 0x2df   :  { %2353 = vpow2.f32 %v585_v23  ;;  %v558_v25 = vsub.f32 %v2696_v28, %v540_v24 }
 0x2e1   :  { %v2748_v14 = vpop.eup %2349  ;;  %v587_v29 = vmul.f32 1.442695, %v558_v25 }
 0x2e2   :  { %613 = vadd.xlane.f32.xlu0 %v2746_v27  ;;  %611 = vadd.xlane.f32.xlu1 %v2748_v14  ;;  %v542_v30 = vpop.xlane.xlu0 %541 }
 0x2e3   :  { %2355 = vpow2.f32 %v587_v29  ;;  %v559_v20 = vsub.f32 %v2699_v33, %v542_v30 }
 0x2e5   :  { %v2753_v32 = vpop.eup %2351  ;;  %v589_v34 = vmul.f32 1.442695, %v559_v20 }
 0x2e6   :  { %615 = vadd.xlane.f32.xlu1 %v2753_v32  ;;  %v544_v35 = vpop.xlane.xlu0 %543 }
 0x2e7   :  { %2357 = vpow2.f32 %v589_v34  ;;  %v560_v28 = vsub.f32 %v2702_v37, %v544_v35 }
 0x2e9   :  { %v2757_v7 = vpop.eup %2353  ;;  %v591_v38 = vmul.f32 1.442695, %v560_v28 }
 0x2ea   :  { %617 = vadd.xlane.f32.xlu0 %v2757_v7 }
 0x2eb   :  { %2359 = vpow2.f32 %v591_v38 }
 0x2ed   :  { %v2760_v39 = vpop.eup %2355 }
 0x2ee   :  { %619 = vadd.xlane.f32.xlu1 %v2760_v39 }
 0x2f1   :  { %v2763_v33 = vpop.eup %2357 }
 0x2f2   :  { %621 = vadd.xlane.f32.xlu0 %v2763_v33 }
 0x2f5   :  { %v2766_v40 = vpop.eup %2359 }
 0x2f6   :  { %623 = vadd.xlane.f32.xlu1 %v2766_v40 }
 0x34b   :  { %v594_v42 = vpop.xlane.xlu0 %593 }
 0x34c   :  { %v625_v37 = vmul.f32 8.0, %v594_v42 }
 0x34e   :  { %2361 = vrcp.f32 %v625_v37 }
 0x34f   :  { %v596_v43 = vpop.xlane.xlu0 %595 }
 0x350   :  { %v626_v44 = vmul.f32 8.0, %v596_v43 }
 0x352   :  { %2363 = vrcp.f32 %v626_v44 }
 0x353   :  { %v598_v45 = vpop.xlane.xlu0 %597 }
 0x354   :  { %v627_v46 = vmul.f32 8.0, %v598_v45 }
 0x356   :  { %2365 = vrcp.f32 %v627_v46 }
 0x357   :  { %v600_v48 = vpop.xlane.xlu0 %599 }
 0x358   :  { %v2362_v49 = vpop.eup %2361  ;;  %v628_v50 = vmul.f32 8.0, %v600_v48 }
 0x359   :  { %v657_v53 = vmul.f32 %v2362_v49, %v2709_v51 }
 0x35a   :  { %2367 = vrcp.f32 %v628_v50  ;;  %v2313_v50 = vld [vmem:[#allocation3 + $0xc0] sm:$0xff]  }
 0x35b   :  { %2093 = vmatprep.mubr.f32.mxu1 %v657_v53  ;;  %v602_v22 = vpop.xlane.xlu0 %601  ;;  %v2314_v53 = vld [vmem:[#allocation3 + $0x80] sm:$0xff]   ;;  %1927 = vmatprep.subr.bf16.mxu0 %v2313_v50 }
 0x35c   :  { %v2364_v54 = vpop.eup %2363  ;;  %v629_v55 = vmul.f32 8.0, %v602_v22  ;;  %1928 = vmatpush3.bf16.msra.mxu0 %v2314_v53  ;;  %v2317_v22 = vld [vmem:[#allocation3 + $0xd0] sm:$0xff]  }
 0x35d   :  { %v658_v31 = vmul.f32 %v2364_v54, %v2713_v26  ;;  %v2318_v54 = vld [vmem:[#allocation3 + $0x90] sm:$0xff]  }
 0x35e   :  { %2369 = vrcp.f32 %v629_v55  ;;  %v2568_v55 = vmov 0  }
 0x35f   :  { %v604_v36 = vpop.xlane.xlu1 %603  ;;  %2094 = vmatmul.mubr.f32.vlgmr.msra.gmra.mrb[0].mxu1 %v658_v31  ;;  %850 = vst [vmem:[#allocation2] sm:$0xff] %v2568_v55  ;;  %859 = vst [vmem:[#allocation2 + $0x48] sm:$0xff] %v2568_v55  ;;  %1065 = vmatprep.mubr.bf16.mxu0 %v2568_v55  ;;  %v2322_v31 = vld [vmem:[#allocation3 + $0xa0] sm:$0xff]  }
 0x360   :  { %v630_v59 = vmul.f32 8.0, %v604_v36  ;;  %v2366_v60 = vpop.eup %2365  ;;  %852 = vst [vmem:[#allocation2 + $0x10] sm:$0xff] %v2568_v55  ;;  %854 = vst [vmem:[#allocation2 + $0x20] sm:$0xff] %v2568_v55  ;;  %v2323_v36 = vld [vmem:[#allocation3 + $0xe8] sm:$0xff]  }
 0x361   :  { %v659_v41 = vmul.f32 %v2366_v60, %v2717_v56  ;;  %856 = vst [vmem:[#allocation2 + $0x30] sm:$0xff] %v2568_v55  ;;  %861 = vst [vmem:[#allocation2 + $0x58] sm:$0xff] %v2568_v55  ;;  %v2325_v60 = vld [vmem:[#allocation3 + $0xf0] sm:$0xff]  }
 0x362   :  { %2371 = vrcp.f32 %v630_v59  ;;  %863 = vst [vmem:[#allocation2 + $0x68] sm:$0xff] %v2568_v55  ;;  %865 = vst [vmem:[#allocation2 + $0x78] sm:$0xff] %v2568_v55  ;;  %v2324_v59 = vld [vmem:[#allocation3 + $0xa8] sm:$0xff]  }
 0x363   :  { %v606_v62 = vpop.xlane.xlu0 %605  ;;  %2096 = vmatprep.mubr.f32.mxu1 %v659_v41  ;;  %v2326_v41 = vld [vmem:[#allocation3 + $0xb0] sm:$0xff]  }
 0x364   :  { %v631_v63 = vmul.f32 8.0, %v606_v62  ;;  %v2368_v1 = vpop.eup %2367  ;;  %v2327_v62 = vld [vmem:[#allocation3 + $0xf8] sm:$0xff]  }
 0x365   :  { %v660_v51 = vmul.f32 %v2368_v1, %v2721_v61  ;;  %v1844_v1 = vld [vmem:[#allocation6 + $0x80] ss:$0 sm:$0xff] }
 0x366   :  { %2373 = vrcp.f32 %v631_v63  ;;  %v2328_v63 = vld [vmem:[#allocation3 + $0xb8] sm:$0xff]  }
 0x367   :  { %v608_v2 = vpop.xlane.xlu1 %607  ;;  %2097 = vmatmul.mubr.f32.gmra.mrb[0].mxu1 %v660_v51 }
 0x368   :  { %v632_v4 = vmul.f32 8.0, %v608_v2  ;;  %v2370_v6 = vpop.eup %2369 }
 0x369   :  { %v661_v26 = vmul.f32 %v2370_v6, %v2725_v47 }
 0x36a   :  { %2375 = vrcp.f32 %v632_v4 }
 0x36b   :  { %v610_v52 = vpop.xlane.xlu0 %609  ;;  %2099 = vmatprep.mubr.f32.mxu1 %v661_v26 }
 0x36c   :  { %v2372_v10 = vpop.eup %2371  ;;  %v633_v11 = vmul.f32 8.0, %v610_v52 }
 0x36d   :  { %v662_v56 = vmul.f32 %v2372_v10, %v2730_v9 }
 0x36e   :  { %2377 = vrcp.f32 %v633_v11 }
 0x36f   :  { %v612_v12 = vpop.xlane.xlu1 %611  ;;  %v614_v58 = vpop.xlane.xlu0 %613  ;;  %2100 = vmatmul.mubr.f32.gmra.mrb[0].mxu1 %v662_v56 }
 0x370   :  { %v2374_v15 = vpop.eup %2373  ;;  %v634_v21 = vmul.f32 8.0, %v612_v12  ;;  %v635_v61 = vmul.f32 8.0, %v614_v58 }
 0x371   :  { %v663_v0 = vmul.f32 %v2374_v15, %v2734_v13 }
 0x372   :  { %2379 = vrcp.f32 %v634_v21 }
 0x373   :  { %2381 = vrcp.f32 %v635_v61  ;;  %v616_v17 = vpop.xlane.xlu1 %615  ;;  %2102 = vmatprep.mubr.f32.mxu1 %v663_v0 }
 0x374   :  { %v2376_v47 = vpop.eup %2375  ;;  %v636_v18 = vmul.f32 8.0, %v616_v17 }
 0x375   :  { %v664_v19 = vmul.f32 %v2376_v47, %v2738_v16 }
 0x376   :  { %2383 = vrcp.f32 %v636_v18 }
 0x377   :  { %v618_v23 = vpop.xlane.xlu0 %617  ;;  %2103 = vmatmul.mubr.f32.gmra.mrb[0].mxu1 %v664_v19 }
 0x378   :  { %v2378_v24 = vpop.eup %2377  ;;  %v637_v9 = vmul.f32 8.0, %v618_v23 }
 0x379   :  { %v665_v25 = vmul.f32 %v2378_v24, %v2742_v8 }
 0x37a   :  { %2385 = vrcp.f32 %v637_v9 }
 0x37b   :  { %v620_v29 = vpop.xlane.xlu1 %619  ;;  %2105 = vmatprep.mubr.f32.mxu1 %v665_v25 }
 0x37c   :  { %v2380_v30 = vpop.eup %2379  ;;  %v638_v20 = vmul.f32 8.0, %v620_v29 }
 0x37d   :  { %v2382_v13 = vpop.eup %2381  ;;  %v666_v34 = vmul.f32 %v2380_v30, %v2748_v14 }
 0x37e   :  { %v667_v35 = vmul.f32 %v2382_v13, %v2746_v27  ;;  %2387 = vrcp.f32 %v638_v20 }
 0x37f   :  { %v622_v28 = vpop.xlane.xlu0 %621  ;;  %2106 = vmatmul.mubr.f32.gmra.mrb[0].mxu1 %v666_v34 }
 0x380   :  { %v639_v16 = vmul.f32 8.0, %v622_v28  ;;  %2108 = vmatprep.mubr.f32.mxu1 %v667_v35  ;;  %v2384_v38 = vpop.eup %2383 }
 0x381   :  { %v668_v44 = vmul.f32 %v2384_v38, %v2753_v32  ;;  %v2315_v32 = vld [vmem:[#allocation3 + $0xc8] sm:$0xff]  }
 0x382   :  { %2389 = vrcp.f32 %v639_v16  ;;  %1929 = vmatprep.subr.bf16.mxu0 %v2315_v32 }
 0x383   :  { %v624_v42 = vpop.xlane.xlu1 %623 }
 0x384   :  { %v2386_v37 = vpop.eup %2385  ;;  %v640_v8 = vmul.f32 8.0, %v624_v42 }
 0x385   :  { %v669_v43 = vmul.f32 %v2386_v37, %v2757_v7  ;;  %v2316_v7 = vld [vmem:[#allocation3 + $0x88] sm:$0xff]  }
 0x386   :  { %2391 = vrcp.f32 %v640_v8  ;;  %1930 = vmatpush3.bf16.msra.mxu0 %v2316_v7 }
 0x387   :  { %2109 = vmatmul.mubr.f32.gmra.mrb[0].mxu1 %v668_v44  ;;  %1931 = vmatprep.subr.bf16.mxu0 %v2317_v22 }
 0x388   :  { %2111 = vmatprep.mubr.f32.mxu1 %v669_v43  ;;  %v2388_v14 = vpop.eup %2387 }
 0x389   :  { %v670_v46 = vmul.f32 %v2388_v14, %v2760_v39  ;;  %v2320_v39 = vld [vmem:[#allocation3 + $0x98] sm:$0xff]  }
 0x38a   :  { %1932 = vmatpush3.bf16.msra.mxu0 %v2318_v54 }
 0x38c   :  { %v2390_v45 = vpop.eup %2389 }
 0x38d   :  { %v671_v27 = vmul.f32 %v2390_v45, %v2763_v33  ;;  %v2319_v33 = vld [vmem:[#allocation3 + $0xd8] sm:$0xff]  }
 0x38e   :  { %1933 = vmatprep.subr.bf16.mxu0 %v2319_v33 }
 0x38f   :  { %2112 = vmatmul.mubr.f32.gmra.mrb[0].mxu1 %v670_v46  ;;  %1934 = vmatpush3.bf16.msra.mxu0 %v2320_v39 }
 0x390   :  { %2114 = vmatprep.mubr.f32.mxu1 %v671_v27  ;;  %v2392_v48 = vpop.eup %2391 }
 0x391   :  { %v672_v49 = vmul.f32 %v2392_v48, %v2766_v40  ;;  %v2321_v40 = vld [vmem:[#allocation3 + $0xe0] sm:$0xff]  }
 0x392   :  { %1935 = vmatprep.subr.bf16.mxu0 %v2321_v40 }
 0x393   :  { %1936 = vmatpush3.bf16.msra.mxu0 %v2322_v31 }
 0x394   :  { %1937 = vmatprep.subr.bf16.mxu0 %v2323_v36 }
 0x397   :  { %2115 = vmatmul.mubr.f32.gmra.mrb[0].mxu1 %v672_v49  ;;  %1938 = vmatpush3.bf16.msra.mxu0 %v2324_v59 }
 0x398   :  { %1939 = vmatprep.subr.bf16.mxu0 %v2325_v60 }
 0x39b   :  { %1940 = vmatpush3.bf16.msra.mxu0 %v2326_v41 }
 0x39c   :  { %1941 = vmatprep.subr.bf16.mxu0 %v2327_v62 }
 0x39f   :  { %1942 = vmatpush3.bf16.msra.mxu0 %v2328_v63 }
 0x46a   :  { %v2116_v51 = vpop.f32.mrb[0].mxu1 }
 0x46b   :  { %v837_v2 = vadd.f32 %v2116_v51, %v1844_v1  ;;  %v809_v4 = vpop.f32.mrb[1].mxu1 }
 0x46c   :  { %v836_v6 = vadd.f32 %v1844_v1, %v809_v4 }
 0x46d   :  { %v841_v26 = vmin.f32 %v837_v2, 0.0  ;;  %vm839_vm0 = vcmp.gt.f32.partialorder %v837_v2, 0.0 }
 0x46e   :  { %v840_v52 = vmin.f32 %v836_v6, 0.0  ;;  %vm838_vm1 = vcmp.gt.f32.partialorder %v836_v6, 0.0 }
 0x46f   :  { %v844_v10 = vmul.f32 1.442695, %v841_v26 }
 0x470   :  { %v842_v11 = vmul.f32 1.442695, %v840_v52 }
 0x471   :  { %2393 = vpow2.f32 %v844_v10 }
 0x472   :  { %2395 = vpow2.f32 %v842_v11 }
 0x47b   :  { %v2394_v56 = vpop.eup %2393 }
 0x47c   :  { %v2396_v12 = vpop.eup %2395  ;;  %v1846_v58 = vadd.f32 -1.0, %v2394_v56 }
 0x47d   :  { %v1845_v15 = vadd.f32 -1.0, %v2396_v12 }
 0x47e   :  { %v849_v21 = vsel %vm839_vm0, %v837_v2, %v1846_v58 }
 0x47f   :  { %v848_v61 = vsel %vm838_vm1, %v836_v6, %v1845_v15 }
 0x480   :  { %v866_v0 = vpack.c.bf16 %v849_v21, %v848_v61 }
 0x482   :  { %868 = vst.msk [vmem:[#allocation2] sm:$0xff] %vm867_vm2, %v866_v0  ;;  %885 = vst.msk [vmem:[#allocation2 + $0x48] sm:$0xff] %vm867_vm2, %v866_v0  ;;  %875 = vrot.lane.b32.xlu1 %v866_v0, %s2561_s19  ;;  %870 = vrot.lane.b32.xlu0 %v866_v0, %s2569_s8 }
 0x486   :  { %880 = vrot.lane.b32.xlu1 %v866_v0, %s2567_s1 }
 0x489   :  { %v889_v17 = vld [vmem:[#allocation2] sm:$0xff]  ;;  %v898_v25 = vld [vmem:[#allocation2 + $0x48] sm:$0xff] }
 0x48a   :  { %1066 = vmatmul.mubr.bf16.vlgmr.msra.gmra.mrb[16].mxu0 %v889_v17 }
 0x48b   :  { %1073 = vmatprep.mubr.bf16.mxu0 %v2568_v55 }
 0x4f4   :  { %v876_v47 = vpop.permute.xlu1 %875  ;;  %v871_v18 = vpop.permute.xlu0 %870 }
 0x4f5   :  { %879 = vst.msk [vmem:[#allocation2 + $0x20] sm:$0xff] %vm878_vm3, %v876_v47  ;;  %887 = vst.msk [vmem:[#allocation2 + $0x68] sm:$0xff] %vm878_vm3, %v876_v47 }
 0x4f6   :  { %874 = vst.msk [vmem:[#allocation2 + $0x10] sm:$0xff] %vm873_vm4, %v871_v18  ;;  %886 = vst.msk [vmem:[#allocation2 + $0x58] sm:$0xff] %vm873_vm4, %v871_v18 }
 0x4f8   :  { %v881_v19 = vpop.permute.xlu1 %880 }
 0x4f9   :  { %884 = vst.msk [vmem:[#allocation2 + $0x30] sm:$0xff] %vm883_vm5, %v881_v19  ;;  %888 = vst.msk [vmem:[#allocation2 + $0x78] sm:$0xff] %vm883_vm5, %v881_v19 }
 0x4fc   :  { %v893_v24 = vld [vmem:[#allocation2 + $0x20] sm:$0xff]  ;;  %v902_v30 = vld [vmem:[#allocation2 + $0x68] sm:$0xff] }
 0x4fd   :  { %v891_v23 = vld [vmem:[#allocation2 + $0x10] sm:$0xff]  ;;  %v900_v29 = vld [vmem:[#allocation2 + $0x58] sm:$0xff] }
 0x4fe   :  { %1074 = vmatmul.mubr.bf16.gmra.mrb[20].mxu0 %v891_v23 }
 0x4ff   :  { %1081 = vmatprep.mubr.bf16.mxu0 %v2568_v55 }
 0x500   :  { %v895_v9 = vld [vmem:[#allocation2 + $0x30] sm:$0xff]  ;;  %v904_v13 = vld [vmem:[#allocation2 + $0x78] sm:$0xff] }
 0x506   :  { %1082 = vmatmul.mubr.bf16.gmra.mrb[24].mxu0 %v893_v24 }
 0x507   :  { %1089 = vmatprep.mubr.bf16.mxu0 %v2568_v55 }
 0x50e   :  { %1090 = vmatmul.mubr.bf16.gmra.mrb[28].mxu0 %v895_v9 }
 0x50f   :  { %1097 = vmatprep.mubr.bf16.mxu0 %v898_v25 }
 0x516   :  { %1098 = vmatmul.mubr.bf16.gmra.mrb[32].mxu0 %v2568_v55 }
 0x517   :  { %1105 = vmatprep.mubr.bf16.mxu0 %v900_v29 }
 0x51e   :  { %1106 = vmatmul.mubr.bf16.gmra.mrb[36].mxu0 %v2568_v55 }
 0x51f   :  { %1113 = vmatprep.mubr.bf16.mxu0 %v902_v30 }
 0x526   :  { %1114 = vmatmul.mubr.bf16.gmra.mrb[40].mxu0 %v2568_v55 }
 0x527   :  { %1121 = vmatprep.mubr.bf16.mxu0 %v904_v13 }
 0x52e   :  { %1122 = vmatmul.mubr.bf16.gmra.mrb[44].mxu0 %v2568_v55 }
 0x55d   :  { %v1943_v20 = vpop.f32.mrb[16].mxu0 }
 0x55e   :  { %v1944_v34 = vpop.f32.mrb[17].mxu0 }
 0x55f   :  { %v2805_v35 = vadd.f32 %v1944_v34, %v1943_v20  ;;  %v1946_v28 = vpop.f32.mrb[18].mxu0 }
 0x560   :  { %v1947_v16 = vpop.f32.mrb[19].mxu0 }
 0x561   :  { %v2807_v38 = vadd.f32 %v1947_v16, %v1946_v28  ;;  %1146 = vrot.lane.b32.xlu0 %v2805_v35, %s2567_s1 }
 0x563   :  { %1148 = vrot.lane.b32.xlu1 %v2807_v38, %s2567_s1  ;;  %v2216_v42 = vpack.c.bf16 %v2807_v38, %v2805_v35 }
 0x565   :  { %2217 = vmatprep.subr.bf16.mxu1 %v2216_v42 }
 0x566   :  { %2219 = vmatpush3.bf16.msra.mxu1 %v2216_v42 }
 0x5d1   :  { %v1949_v37 = vpop.f32.mrb[20].mxu0 }
 0x5d2   :  { %v1950_v8 = vpop.f32.mrb[21].mxu0 }
 0x5d3   :  { %v2815_v43 = vadd.f32 %v1950_v8, %v1949_v37  ;;  %v1952_v44 = vpop.f32.mrb[22].mxu0  ;;  %v1147_v9 = vpop.permute.xlu0 %1146 }
 0x5d4   :  { %v1953_v14 = vpop.f32.mrb[23].mxu0 }
 0x5d5   :  { %v2817_v45 = vadd.f32 %v1953_v14, %v1952_v44  ;;  %1150 = vrot.lane.b32.xlu0 %v2815_v43, %s2567_s1  ;;  %v1149_v25 = vpop.permute.xlu1 %1148 }
 0x5d7   :  { %1152 = vrot.lane.b32.xlu1 %v2817_v45, %s2567_s1  ;;  %v2220_v27 = vpack.c.bf16 %v2817_v45, %v2815_v43 }
 0x5d9   :  { %v1955_v46 = vpop.f32.mrb[24].mxu0  ;;  %2221 = vmatprep.subr.bf16.mxu1 %v2220_v27 }
 0x5da   :  { %v1956_v48 = vpop.f32.mrb[25].mxu0  ;;  %2223 = vmatpush3.bf16.msra.mxu1 %v2220_v27 }
 0x5db   :  { %v2825_v49 = vadd.f32 %v1956_v48, %v1955_v46  ;;  %v1958_v50 = vpop.f32.mrb[26].mxu0 }
 0x5dc   :  { %v1959_v53 = vpop.f32.mrb[27].mxu0 }
 0x5dd   :  { %v2827_v32 = vadd.f32 %v1959_v53, %v1958_v50  ;;  %1154 = vrot.lane.b32.xlu0 %v2825_v49, %s2567_s1 }
 0x5df   :  { %1156 = vrot.lane.b32.xlu1 %v2827_v32, %s2567_s1  ;;  %v2224_v7 = vpack.c.bf16 %v2827_v32, %v2825_v49 }
 0x5e1   :  { %v1961_v22 = vpop.f32.mrb[28].mxu0  ;;  %2225 = vmatprep.subr.bf16.mxu1 %v2224_v7 }
 0x5e2   :  { %v1962_v54 = vpop.f32.mrb[29].mxu0  ;;  %2227 = vmatpush3.bf16.msra.mxu1 %v2224_v7 }
 0x5e3   :  { %v1963_v33 = vadd.f32 %v1962_v54, %v1961_v22  ;;  %v1964_v39 = vpop.f32.mrb[30].mxu0 }
 0x5e4   :  { %v1965_v55 = vpop.f32.mrb[31].mxu0 }
 0x5e5   :  { %v1966_v40 = vadd.f32 %v1965_v55, %v1964_v39  ;;  %1158 = vrot.lane.b32.xlu0 %v1963_v33, %s2567_s1 }
 0x5e7   :  { %1160 = vrot.lane.b32.xlu1 %v1966_v40, %s2567_s1  ;;  %v2228_v31 = vpack.c.bf16 %v1966_v40, %v1963_v33 }
 0x5e9   :  { %v1967_v36 = vpop.f32.mrb[32].mxu0  ;;  %2229 = vmatprep.subr.bf16.mxu1 %v2228_v31 }
 0x5ea   :  { %v1968_v59 = vpop.f32.mrb[33].mxu0  ;;  %2231 = vmatpush3.bf16.msra.mxu1 %v2228_v31 }
 0x5eb   :  { %v1969_v60 = vadd.f32 %v1968_v59, %v1967_v36  ;;  %v1970_v41 = vpop.f32.mrb[34].mxu0 }
 0x5ec   :  { %v1971_v62 = vpop.f32.mrb[35].mxu0 }
 0x5ed   :  { %v1972_v63 = vadd.f32 %v1971_v62, %v1970_v41  ;;  %1162 = vrot.lane.b32.xlu0 %v1969_v60, %s2567_s1 }
 0x5ef   :  { %1164 = vrot.lane.b32.xlu1 %v1972_v63, %s2567_s1  ;;  %v2232_v1 = vpack.c.bf16 %v1972_v63, %v1969_v60 }
 0x5f1   :  { %v1973_v51 = vpop.f32.mrb[36].mxu0  ;;  %2233 = vmatprep.subr.bf16.mxu1 %v2232_v1 }
 0x5f2   :  { %v1974_v2 = vpop.f32.mrb[37].mxu0  ;;  %2235 = vmatpush3.bf16.msra.mxu1 %v2232_v1 }
 0x5f3   :  { %v1975_v4 = vadd.f32 %v1974_v2, %v1973_v51  ;;  %v1976_v6 = vpop.f32.mrb[38].mxu0  ;;  %v2474_v51 = vld [vmem:[#allocation6 + $0x8] sm:$0xff] }
 0x5f4   :  { %v1977_v26 = vpop.f32.mrb[39].mxu0 }
 0x5f5   :  { %v1978_v52 = vadd.f32 %v1977_v26, %v1976_v6  ;;  %1166 = vrot.lane.b32.xlu0 %v1975_v4, %s2567_s1 }
 0x5f7   :  { %1168 = vrot.lane.b32.xlu1 %v1978_v52, %s2567_s1  ;;  %v2236_v10 = vpack.c.bf16 %v1978_v52, %v1975_v4 }
 0x5f9   :  { %v1979_v11 = vpop.f32.mrb[40].mxu0  ;;  %2237 = vmatprep.subr.bf16.mxu1 %v2236_v10 }
 0x5fa   :  { %v1980_v56 = vpop.f32.mrb[41].mxu0  ;;  %2239 = vmatpush3.bf16.msra.mxu1 %v2236_v10 }
 0x5fb   :  { %v1981_v12 = vadd.f32 %v1980_v56, %v1979_v11  ;;  %v1982_v58 = vpop.f32.mrb[42].mxu0 }
 0x5fc   :  { %v1983_v15 = vpop.f32.mrb[43].mxu0 }
 0x5fd   :  { %v1984_v21 = vadd.f32 %v1983_v15, %v1982_v58  ;;  %1170 = vrot.lane.b32.xlu0 %v1981_v12, %s2567_s1  ;;  %v2476_v58 = vld [vmem:[#allocation6 + $0x18] sm:$0xff] }
 0x5ff   :  { %1172 = vrot.lane.b32.xlu1 %v1984_v21, %s2567_s1  ;;  %v2240_v61 = vpack.c.bf16 %v1984_v21, %v1981_v12 }
 0x601   :  { %v1985_v0 = vpop.f32.mrb[44].mxu0  ;;  %2241 = vmatprep.subr.bf16.mxu1 %v2240_v61 }
 0x602   :  { %v1986_v17 = vpop.f32.mrb[45].mxu0  ;;  %2243 = vmatpush3.bf16.msra.mxu1 %v2240_v61 }
 0x603   :  { %v1987_v47 = vadd.f32 %v1986_v17, %v1985_v0  ;;  %v1988_v18 = vpop.f32.mrb[46].mxu0 }
 0x604   :  { %v1989_v19 = vpop.f32.mrb[47].mxu0 }
 0x605   :  { %v1990_v23 = vadd.f32 %v1989_v19, %v1988_v18  ;;  %1174 = vrot.lane.b32.xlu0 %v1987_v47, %s2567_s1 }
 0x607   :  { %1176 = vrot.lane.b32.xlu1 %v1990_v23, %s2567_s1  ;;  %v2244_v24 = vpack.c.bf16 %v1990_v23, %v1987_v47 }
 0x609   :  { %1227 = vperm.xlu0 %2295, %v2805_v35   ;;  %2245 = vmatprep.subr.bf16.mxu1 %v2244_v24 }
 0x60a   :  { %2247 = vmatpush3.bf16.msra.mxu1 %v2244_v24 }
 0x60b   :  { %1231 = vperm.xlu1 %2296, %v2807_v38  }
 0x60d   :  { %1235 = vperm.xlu0 %2295, %v2815_v43  }
 0x60f   :  { %1239 = vperm.xlu1 %2296, %v2817_v45  }
 0x611   :  { %1243 = vperm.xlu0 %2295, %v2825_v49  }
 0x613   :  { %1247 = vperm.xlu1 %2296, %v2827_v32  }
 0x615   :  { %1251 = vperm.xlu0 %2295, %v1963_v33  }
 0x617   :  { %1255 = vperm.xlu1 %2296, %v1966_v40  }
 0x61b   :  { %1259 = vperm.xlu1 %2296, %v1969_v60  }
 0x61f   :  { %1263 = vperm.xlu1 %2296, %v1972_v63  }
 0x623   :  { %1267 = vperm.xlu1 %2296, %v1975_v4  }
 0x627   :  { %1271 = vperm.xlu1 %2296, %v1978_v52   ;;  %v2475_v52 = vld [vmem:[#allocation6 + $0x10] sm:$0xff] }
 0x62b   :  { %1275 = vperm.xlu1 %2296, %v1981_v12  }
 0x62f   :  { %1279 = vperm.xlu1 %2296, %v1984_v21  }
 0x633   :  { %1283 = vperm.xlu1 %2296, %v1987_v47   ;;  %1194 = vxpose.xlu0.b32.start [1/16] (narrow) %v1147_v9, 8  ;;  %v2477_v47 = vld [vmem:[#allocation6 + $0x20] sm:$0xff] }
 0x637   :  { %1287 = vperm.xlu1 %2296, %v1990_v23   ;;  %1195 = vxpose.xlu0.b32.cont [2/16] (narrow) %v1149_v25, 8  ;;  %v2478_v25 = vld [vmem:[#allocation6 + $0x28] sm:$0xff] }
 0x647   :  { %v1151_v29 = vpop.permute.xlu0 %1150 }
 0x648   :  { %1196 = vxpose.xlu0.b32.cont [3/16] (narrow) %v1151_v29, 8 }
 0x649   :  { %v1153_v30 = vpop.permute.xlu1 %1152 }
 0x64c   :  { %1197 = vxpose.xlu0.b32.cont [4/16] (narrow) %v1153_v30, 8 }
 0x64f   :  { %v1155_v13 = vpop.permute.xlu0 %1154 }
 0x650   :  { %1198 = vxpose.xlu0.b32.cont [5/16] (narrow) %v1155_v13, 8 }
 0x651   :  { %v1157_v20 = vpop.permute.xlu1 %1156 }
 0x654   :  { %1199 = vxpose.xlu0.b32.cont [6/16] (narrow) %v1157_v20, 8 }
 0x657   :  { %v1159_v34 = vpop.permute.xlu0 %1158 }
 0x658   :  { %1200 = vxpose.xlu0.b32.cont [7/16] (narrow) %v1159_v34, 8  ;;  %v2479_v34 = vld [vmem:[#allocation6 + $0x30] sm:$0xff] }
 0x659   :  { %v1161_v35 = vpop.permute.xlu1 %1160 }
 0x65c   :  { %1201 = vxpose.xlu0.b32.cont [8/16] (narrow) %v1161_v35, 8 }
 0x65f   :  { %v1163_v28 = vpop.permute.xlu0 %1162 }
 0x660   :  { %1202 = vxpose.xlu0.b32.cont [9/16] (narrow) %v1163_v28, 8 }
 0x661   :  { %v1165_v16 = vpop.permute.xlu1 %1164 }
 0x664   :  { %1203 = vxpose.xlu0.b32.cont [10/16] (narrow) %v1165_v16, 8 }
 0x667   :  { %v1167_v38 = vpop.permute.xlu0 %1166 }
 0x668   :  { %1204 = vxpose.xlu0.b32.cont [11/16] (narrow) %v1167_v38, 8 }
 0x669   :  { %v1169_v42 = vpop.permute.xlu1 %1168 }
 0x66c   :  { %1205 = vxpose.xlu0.b32.cont [12/16] (narrow) %v1169_v42, 8 }
 0x66f   :  { %v1171_v37 = vpop.permute.xlu0 %1170 }
 0x670   :  { %1206 = vxpose.xlu0.b32.cont [13/16] (narrow) %v1171_v37, 8  ;;  %v2480_v37 = vld [vmem:[#allocation6 + $0x40] sm:$0xff] }
 0x671   :  { %v1173_v8 = vpop.permute.xlu1 %1172 }
 0x674   :  { %1207 = vxpose.xlu0.b32.cont [14/16] (narrow) %v1173_v8, 8 }
 0x677   :  { %v1175_v43 = vpop.permute.xlu0 %1174 }
 0x678   :  { %1208 = vxpose.xlu0.b32.cont [15/16] (narrow) %v1175_v43, 8 }
 0x679   :  { %v1177_v44 = vpop.permute.xlu1 %1176 }
 0x67c   :  { %1209 = vxpose.xlu0.b32.end [16/16] (narrow) %v1177_v44, 8 }
 0x688   :  { %v1228_v14 = vpop.permute.xlu0 %1227 }
 0x68a   :  { %v1232_v45 = vpop.permute.xlu1 %1231 }
 0x68c   :  { %v1236_v27 = vpop.permute.xlu0 %1235 }
 0x68e   :  { %v1240_v46 = vpop.permute.xlu1 %1239 }
 0x690   :  { %v1244_v48 = vpop.permute.xlu0 %1243 }
 0x692   :  { %v1248_v49 = vpop.permute.xlu1 %1247 }
 0x694   :  { %v1252_v50 = vpop.permute.xlu0 %1251 }
 0x696   :  { %v1256_v7 = vpop.permute.xlu1 %1255 }
 0x69a   :  { %v1260_v1 = vpop.permute.xlu1 %1259 }
 0x6c0   :  { %v1210_v53 = vpop.trf.xlu0 }
 0x6c1   :  { %v2853_v32 = vrot.slane %v1210_v53, %v447_v5  ;;  %v2473_v5 = vld [vmem:[#allocation6] sm:$0xff]  ;;  %v2482_v53 = vld [vmem:[#allocation6 + $0x50] sm:$0xff] }
 0x6c3   :  { %v1301_v22 = vadd.f32 %v2853_v32, %v1256_v7  ;;  %v1294_v54 = vadd.f32 %v2853_v32, %v1228_v14  ;;  %v1295_v33 = vadd.f32 %v2853_v32, %v1232_v45  ;;  %v1296_v31 = vadd.f32 %v2853_v32, %v1236_v27  ;;  %v2481_v27 = vld [vmem:[#allocation6 + $0x48] sm:$0xff] }
 0x6c4   :  { %v1297_v60 = vadd.f32 %v2853_v32, %v1240_v46  ;;  %v1298_v26 = vadd.f32 %v2853_v32, %v1244_v48  ;;  %v1299_v12 = vadd.f32 %v2853_v32, %v1248_v49  ;;  %v1300_v0 = vadd.f32 %v2853_v32, %v1252_v50 }
 0x6c5   :  { %v1317_v39 = vmul.f32 0.2, %v1301_v22  ;;  %v1310_v55 = vmul.f32 0.2, %v1294_v54  ;;  %v1311_v40 = vmul.f32 0.2, %v1295_v33  ;;  %v1302_v24 = vadd.f32 %v2853_v32, %v1260_v1 }
 0x6c6   :  { %v1312_v63 = vmul.f32 0.2, %v1296_v31  ;;  %v1313_v6 = vmul.f32 0.2, %v1297_v60  ;;  %v1314_v56 = vmul.f32 0.2, %v1298_v26 }
 0x6c7   :  { %v1333_v36 = vmax.f32 %v1301_v22, %v1317_v39  ;;  %v1326_v59 = vmax.f32 %v1294_v54, %v1310_v55  ;;  %v1327_v62 = vmax.f32 %v1295_v33, %v1311_v40  ;;  %v1315_v61 = vmul.f32 0.2, %v1299_v12  ;;  %v2483_v55 = vld [vmem:[#allocation6 + $0x58] sm:$0xff] }
 0x6c8   :  { %v1328_v4 = vmax.f32 %v1296_v31, %v1312_v63  ;;  %v1329_v11 = vmax.f32 %v1297_v60, %v1313_v6  ;;  %v1330_v21 = vmax.f32 %v1298_v26, %v1314_v56  ;;  %v1316_v23 = vmul.f32 0.2, %v1300_v0 }
 0x6c9   :  { %v2861_v3 = vadd.f32 %v1333_v36, %v2672_v57  ;;  %v2863_v41 = vadd.f32 %v2473_v5, %v1326_v59  ;;  %v2867_v2 = vadd.f32 %v2474_v51, %v1327_v62  ;;  %v1264_v57 = vpop.permute.xlu1 %1263  ;;  %v1331_v19 = vmax.f32 %v1299_v12, %v1315_v61  ;;  %v2484_v5 = vld [vmem:[#allocation6 + $0x60] sm:$0xff]  ;;  %v2487_v12 = vld [vmem:[#allocation6 + $0x78] sm:$0xff] }
 0x6ca   :  { %v2871_v10 = vadd.f32 %v2475_v52, %v1328_v4  ;;  %v2875_v15 = vadd.f32 %v2476_v58, %v1329_v11  ;;  %v2879_v18 = vadd.f32 %v2477_v47, %v1330_v21  ;;  %v1332_v30 = vmax.f32 %v1300_v0, %v1316_v23  ;;  %v2485_v4 = vld [vmem:[#allocation6 + $0x68] sm:$0xff]  ;;  %v2486_v52 = vld [vmem:[#allocation6 + $0x70] sm:$0xff] }
 0x6cb   :  { %1372 = vmax.xlane.f32.xlu0 %v2861_v3  ;;  %1358 = vmax.xlane.f32.xlu1 %v2863_v41  ;;  %v2883_v29 = vadd.f32 %v2478_v25, %v1331_v19  ;;  %v1318_v13 = vmul.f32 0.2, %v1302_v24  ;;  %v1303_v20 = vadd.f32 %v2853_v32, %v1264_v57 }
 0x6cc   :  { %v2887_v35 = vadd.f32 %v2479_v34, %v1332_v30 }
 0x6cd   :  { %v1268_v17 = vpop.permute.xlu1 %1267  ;;  %v1334_v28 = vmax.f32 %v1302_v24, %v1318_v13  ;;  %v1319_v16 = vmul.f32 0.2, %v1303_v20 }
 0x6ce   :  { %v1304_v38 = vadd.f32 %v2853_v32, %v1268_v17 }
 0x6cf   :  { %1360 = vmax.xlane.f32.xlu1 %v2867_v2  ;;  %v2891_v8 = vadd.f32 %v2480_v37, %v1334_v28  ;;  %v1335_v43 = vmax.f32 %v1303_v20, %v1319_v16 }
 0x6d0   :  { %v1320_v44 = vmul.f32 0.2, %v1304_v38 }
 0x6d1   :  { %v1272_v9 = vpop.permute.xlu1 %1271  ;;  %v2895_v46 = vadd.f32 %v2481_v27, %v1335_v43 }
 0x6d2   :  { %v1305_v14 = vadd.f32 %v2853_v32, %v1272_v9  ;;  %v1336_v48 = vmax.f32 %v1304_v38, %v1320_v44 }
 0x6d3   :  { %1362 = vmax.xlane.f32.xlu1 %v2871_v10 }
 0x6d4   :  { %v1321_v49 = vmul.f32 0.2, %v1305_v14  ;;  %v2899_v7 = vadd.f32 %v2482_v53, %v1336_v48 }
 0x6d5   :  { %v1276_v42 = vpop.permute.xlu1 %1275 }
 0x6d6   :  { %v1306_v50 = vadd.f32 %v2853_v32, %v1276_v42  ;;  %v1337_v22 = vmax.f32 %v1305_v14, %v1321_v49 }
 0x6d7   :  { %1364 = vmax.xlane.f32.xlu1 %v2875_v15 }
 0x6d8   :  { %v1322_v54 = vmul.f32 0.2, %v1306_v50  ;;  %v2903_v40 = vadd.f32 %v2483_v55, %v1337_v22 }
 0x6d9   :  { %v1280_v45 = vpop.permute.xlu1 %1279 }
 0x6da   :  { %v1307_v33 = vadd.f32 %v2853_v32, %v1280_v45  ;;  %v1338_v31 = vmax.f32 %v1306_v50, %v1322_v54 }
 0x6db   :  { %1366 = vmax.xlane.f32.xlu1 %v2879_v18 }
 0x6dc   :  { %v1323_v36 = vmul.f32 0.2, %v1307_v33  ;;  %v2907_v62 = vadd.f32 %v2484_v5, %v1338_v31 }
 0x6dd   :  { %v1284_v39 = vpop.permute.xlu1 %1283 }
 0x6de   :  { %v1308_v59 = vadd.f32 %v2853_v32, %v1284_v39  ;;  %v1339_v63 = vmax.f32 %v1307_v33, %v1323_v36 }
 0x6df   :  { %1368 = vmax.xlane.f32.xlu1 %v2883_v29 }
 0x6e0   :  { %v1324_v1 = vmul.f32 0.2, %v1308_v59  ;;  %v2911_v6 = vadd.f32 %v2485_v4, %v1339_v63 }
 0x6e1   :  { %v1288_v60 = vpop.permute.xlu1 %1287 }
 0x6e2   :  { %v1309_v51 = vadd.f32 %v2853_v32, %v1288_v60  ;;  %v1340_v26 = vmax.f32 %v1308_v59, %v1324_v1 }
 0x6e3   :  { %1370 = vmax.xlane.f32.xlu1 %v2887_v35 }
 0x6e4   :  { %v1325_v57 = vmul.f32 0.2, %v1309_v51  ;;  %v2914_v11 = vadd.f32 %v2486_v52, %v1340_v26 }
 0x6e6   :  { %v1341_v56 = vmax.f32 %v1309_v51, %v1325_v57 }
 0x6e7   :  { %1374 = vmax.xlane.f32.xlu1 %v2891_v8 }
 0x6e8   :  { %v2917_v58 = vadd.f32 %v2487_v12, %v1341_v56 }
 0x6eb   :  { %1376 = vmax.xlane.f32.xlu1 %v2895_v46 }
 0x6ef   :  { %1378 = vmax.xlane.f32.xlu1 %v2899_v7 }
 0x6f3   :  { %1380 = vmax.xlane.f32.xlu1 %v2903_v40 }
 0x6f7   :  { %1382 = vmax.xlane.f32.xlu1 %v2907_v62 }
 0x6fb   :  { %1384 = vmax.xlane.f32.xlu1 %v2911_v6 }
 0x6ff   :  { %1386 = vmax.xlane.f32.xlu1 %v2914_v11 }
 0x703   :  { %1388 = vmax.xlane.f32.xlu1 %v2917_v58 }
 0x758   :  { %v1359_v32 = vpop.xlane.xlu1 %1358 }
 0x759   :  { %v1390_v21 = vsub.f32 %v2863_v41, %v1359_v32  ;;  %v1373_v41 = vpop.xlane.xlu0 %1372 }
 0x75b   :  { %v1406_v61 = vmul.f32 1.442695, %v1390_v21  ;;  %v1877_v21 = vld [vmem:[#allocation3 + $0x100] sm:$0xff]  }
 0x75c   :  { %v1361_v0 = vpop.xlane.xlu1 %1360  ;;  %2249 = vmatprep.subr.bf16.mxu1 %v1877_v21 }
 0x75d   :  { %v1391_v17 = vsub.f32 %v2867_v2, %v1361_v0  ;;  %2397 = vpow2.f32 %v1406_v61 }
 0x75f   :  { %v1408_v47 = vmul.f32 1.442695, %v1391_v17 }
 0x760   :  { %v1363_v19 = vpop.xlane.xlu1 %1362 }
 0x761   :  { %2399 = vpow2.f32 %v1408_v47  ;;  %v1392_v23 = vsub.f32 %v2871_v10, %v1363_v19  ;;  %v1397_v10 = vsub.f32 %v2861_v3, %v1373_v41 }
 0x763   :  { %v1410_v24 = vmul.f32 1.442695, %v1392_v23  ;;  %v1420_v37 = vmul.f32 1.442695, %v1397_v10  ;;  %v1878_v10 = vld [vmem:[#allocation3 + $0x108] sm:$0xff]  }
 0x764   :  { %v1365_v9 = vpop.xlane.xlu1 %1364 }
 0x765   :  { %2401 = vpow2.f32 %v1410_v24  ;;  %v1393_v25 = vsub.f32 %v2875_v15, %v1365_v9 }
 0x767   :  { %v1412_v30 = vmul.f32 1.442695, %v1393_v25  ;;  %v2924_v13 = vpop.eup %2397 }
 0x768   :  { %v1367_v20 = vpop.xlane.xlu1 %1366  ;;  %1438 = vadd.xlane.f32.xlu1 %v2924_v13 }
 0x769   :  { %2403 = vpow2.f32 %v1412_v30  ;;  %v1394_v2 = vsub.f32 %v2879_v18, %v1367_v20 }
 0x76b   :  { %v2928_v34 = vpop.eup %2399  ;;  %v1414_v28 = vmul.f32 1.442695, %v1394_v2 }
 0x76c   :  { %v1369_v16 = vpop.xlane.xlu1 %1368  ;;  %1440 = vadd.xlane.f32.xlu1 %v2928_v34 }
 0x76d   :  { %2405 = vpow2.f32 %v1414_v28  ;;  %v1395_v15 = vsub.f32 %v2883_v29, %v1369_v16 }
 0x76f   :  { %v2933_v38 = vpop.eup %2401  ;;  %v1416_v42 = vmul.f32 1.442695, %v1395_v15 }
 0x770   :  { %v1371_v43 = vpop.xlane.xlu1 %1370  ;;  %1442 = vadd.xlane.f32.xlu1 %v2933_v38 }
 0x771   :  { %2407 = vpow2.f32 %v1416_v42  ;;  %v1396_v18 = vsub.f32 %v2887_v35, %v1371_v43 }
 0x772   :  { %2409 = vpow2.f32 %v1420_v37 }
 0x773   :  { %v2937_v44 = vpop.eup %2403  ;;  %v1418_v14 = vmul.f32 1.442695, %v1396_v18 }
 0x774   :  { %1444 = vadd.xlane.f32.xlu0 %v2937_v44  ;;  %v1375_v3 = vpop.xlane.xlu1 %1374 }
 0x775   :  { %2411 = vpow2.f32 %v1418_v14  ;;  %v1398_v29 = vsub.f32 %v2891_v8, %v1375_v3 }
 0x777   :  { %v2941_v45 = vpop.eup %2405  ;;  %v1422_v27 = vmul.f32 1.442695, %v1398_v29 }
 0x778   :  { %1446 = vadd.xlane.f32.xlu1 %v2941_v45  ;;  %v1377_v48 = vpop.xlane.xlu1 %1376 }
 0x779   :  { %2413 = vpow2.f32 %v1422_v27  ;;  %v1399_v49 = vsub.f32 %v2895_v46, %v1377_v48 }
 0x77b   :  { %v2945_v35 = vpop.eup %2407  ;;  %v1424_v50 = vmul.f32 1.442695, %v1399_v49 }
 0x77c   :  { %1448 = vadd.xlane.f32.xlu0 %v2945_v35  ;;  %v1379_v53 = vpop.xlane.xlu1 %1378  ;;  %v2949_v54 = vpop.eup %2409 }
 0x77d   :  { %2415 = vpow2.f32 %v1424_v50  ;;  %v1400_v22 = vsub.f32 %v2899_v7, %v1379_v53 }
 0x77f   :  { %v2951_v8 = vpop.eup %2411  ;;  %v1426_v33 = vmul.f32 1.442695, %v1400_v22 }
 0x780   :  { %1452 = vadd.xlane.f32.xlu0 %v2949_v54  ;;  %1450 = vadd.xlane.f32.xlu1 %v2951_v8  ;;  %v1381_v39 = vpop.xlane.xlu1 %1380 }
 0x781   :  { %2417 = vpow2.f32 %v1426_v33  ;;  %v1401_v46 = vsub.f32 %v2903_v40, %v1381_v39 }
 0x783   :  { %v2956_v55 = vpop.eup %2413  ;;  %v1428_v31 = vmul.f32 1.442695, %v1401_v46 }
 0x784   :  { %1454 = vadd.xlane.f32.xlu1 %v2956_v55  ;;  %v1383_v36 = vpop.xlane.xlu1 %1382 }
 0x785   :  { %2419 = vpow2.f32 %v1428_v31  ;;  %v1402_v7 = vsub.f32 %v2907_v62, %v1383_v36 }
 0x787   :  { %v2960_v59 = vpop.eup %2415  ;;  %v1430_v60 = vmul.f32 1.442695, %v1402_v7 }
 0x788   :  { %1456 = vadd.xlane.f32.xlu0 %v2960_v59  ;;  %v1385_v5 = vpop.xlane.xlu1 %1384 }
 0x789   :  { %2421 = vpow2.f32 %v1430_v60  ;;  %v1403_v63 = vsub.f32 %v2911_v6, %v1385_v5 }
 0x78b   :  { %v2964_v1 = vpop.eup %2417  ;;  %v1432_v40 = vmul.f32 1.442695, %v1403_v63 }
 0x78c   :  { %1458 = vadd.xlane.f32.xlu1 %v2964_v1  ;;  %v1387_v51 = vpop.xlane.xlu1 %1386 }
 0x78d   :  { %2423 = vpow2.f32 %v1432_v40  ;;  %v1404_v4 = vsub.f32 %v2914_v11, %v1387_v51 }
 0x78f   :  { %v2968_v26 = vpop.eup %2419  ;;  %v1434_v62 = vmul.f32 1.442695, %v1404_v4 }
 0x790   :  { %1460 = vadd.xlane.f32.xlu0 %v2968_v26  ;;  %v1389_v57 = vpop.xlane.xlu1 %1388 }
 0x791   :  { %2425 = vpow2.f32 %v1434_v62  ;;  %v1405_v52 = vsub.f32 %v2917_v58, %v1389_v57 }
 0x793   :  { %v2972_v56 = vpop.eup %2421  ;;  %v1436_v6 = vmul.f32 1.442695, %v1405_v52 }
 0x794   :  { %1462 = vadd.xlane.f32.xlu1 %v2972_v56 }
 0x795   :  { %2427 = vpow2.f32 %v1436_v6 }
 0x797   :  { %v2975_v12 = vpop.eup %2423 }
 0x798   :  { %1464 = vadd.xlane.f32.xlu0 %v2975_v12 }
 0x79b   :  { %v2978_v11 = vpop.eup %2425 }
 0x79c   :  { %1466 = vadd.xlane.f32.xlu1 %v2978_v11 }
 0x79f   :  { %v2981_v32 = vpop.eup %2427 }
 0x7a0   :  { %1468 = vadd.xlane.f32.xlu0 %v2981_v32 }
 0x7f5   :  { %v1439_v58 = vpop.xlane.xlu1 %1438 }
 0x7f6   :  { %v1470_v61 = vmul.f32 8.0, %v1439_v58 }
 0x7f8   :  { %2429 = vrcp.f32 %v1470_v61 }
 0x7f9   :  { %v1441_v0 = vpop.xlane.xlu1 %1440 }
 0x7fa   :  { %v1471_v17 = vmul.f32 8.0, %v1441_v0 }
 0x7fc   :  { %2431 = vrcp.f32 %v1471_v17 }
 0x7fd   :  { %v1443_v47 = vpop.xlane.xlu1 %1442 }
 0x7fe   :  { %v1472_v19 = vmul.f32 8.0, %v1443_v47 }
 0x800   :  { %2433 = vrcp.f32 %v1472_v19 }
 0x801   :  { %v1445_v23 = vpop.xlane.xlu0 %1444 }
 0x802   :  { %v1473_v24 = vmul.f32 8.0, %v1445_v23  ;;  %v2430_v9 = vpop.eup %2429  ;;  %v1863_v23 = vld [vmem:[#allocation6 + $0x88] ss:$0 sm:$0xff] }
 0x803   :  { %v1502_v25 = vmul.f32 %v2430_v9, %v2924_v13 }
 0x804   :  { %2435 = vrcp.f32 %v1473_v24 }
 0x805   :  { %v1447_v30 = vpop.xlane.xlu1 %1446  ;;  %2149 = vmatprep.mubr.f32.mxu1 %v1502_v25 }
 0x806   :  { %v1474_v20 = vmul.f32 8.0, %v1447_v30  ;;  %v2432_v41 = vpop.eup %2431 }
 0x807   :  { %v1503_v2 = vmul.f32 %v2432_v41, %v2928_v34 }
 0x808   :  { %2437 = vrcp.f32 %v1474_v20 }
 0x809   :  { %v1449_v28 = vpop.xlane.xlu0 %1448  ;;  %2150 = vmatmul.mubr.f32.vlgmr.msra.gmra.mrb[2].mxu1 %v1503_v2 }
 0x80a   :  { %v1475_v16 = vmul.f32 8.0, %v1449_v28  ;;  %v2434_v15 = vpop.eup %2433  ;;  %2251 = vmatpush3.bf16.msra.mxu1 %v1877_v21 }
 0x80b   :  { %v1504_v42 = vmul.f32 %v2434_v15, %v2933_v38  ;;  %2253 = vmatprep.subr.bf16.mxu1 %v1878_v10 }
 0x80c   :  { %2439 = vrcp.f32 %v1475_v16  ;;  %v1866_v16 = vld [vmem:[#allocation6 + $0x90] ss:$0 sm:$0xff] }
 0x80d   :  { %v1453_v37 = vpop.xlane.xlu0 %1452  ;;  %v1451_v43 = vpop.xlane.xlu1 %1450  ;;  %2152 = vmatprep.mubr.f32.mxu1 %v1504_v42 }
 0x80e   :  { %v2436_v13 = vpop.eup %2435  ;;  %v1476_v18 = vmul.f32 8.0, %v1451_v43  ;;  %v1477_v14 = vmul.f32 8.0, %v1453_v37  ;;  %2255 = vmatpush3.bf16.msra.mxu1 %v1878_v10 }
 0x80f   :  { %v1505_v3 = vmul.f32 %v2436_v13, %v2937_v44 }
 0x810   :  { %2441 = vrcp.f32 %v1476_v18 }
 0x811   :  { %v1455_v34 = vpop.xlane.xlu1 %1454  ;;  %2153 = vmatmul.mubr.f32.gmra.mrb[2].mxu1 %v1505_v3  ;;  %2443 = vrcp.f32 %v1477_v14 }
 0x812   :  { %v2438_v29 = vpop.eup %2437  ;;  %v1478_v27 = vmul.f32 8.0, %v1455_v34 }
 0x813   :  { %v1506_v48 = vmul.f32 %v2438_v29, %v2941_v45 }
 0x814   :  { %2445 = vrcp.f32 %v1478_v27 }
 0x815   :  { %v1457_v38 = vpop.xlane.xlu0 %1456  ;;  %2155 = vmatprep.mubr.f32.mxu1 %v1506_v48 }
 0x816   :  { %v2440_v49 = vpop.eup %2439  ;;  %v1479_v50 = vmul.f32 8.0, %v1457_v38 }
 0x817   :  { %v1507_v53 = vmul.f32 %v2440_v49, %v2945_v35 }
 0x818   :  { %2447 = vrcp.f32 %v1479_v50 }
 0x819   :  { %v1459_v22 = vpop.xlane.xlu1 %1458  ;;  %2156 = vmatmul.mubr.f32.gmra.mrb[2].mxu1 %v1507_v53 }
 0x81a   :  { %v1480_v33 = vmul.f32 8.0, %v1459_v22  ;;  %v2442_v44 = vpop.eup %2441 }
 0x81b   :  { %v1508_v39 = vmul.f32 %v2442_v44, %v2951_v8  ;;  %v2444_v46 = vpop.eup %2443 }
 0x81c   :  { %2449 = vrcp.f32 %v1480_v33  ;;  %v1509_v60 = vmul.f32 %v2444_v46, %v2949_v54 }
 0x81d   :  { %v1461_v31 = vpop.xlane.xlu0 %1460  ;;  %2158 = vmatprep.mubr.f32.mxu1 %v1508_v39 }
 0x81e   :  { %v2446_v36 = vpop.eup %2445  ;;  %v1481_v45 = vmul.f32 8.0, %v1461_v31 }
 0x81f   :  { %v1510_v7 = vmul.f32 %v2446_v36, %v2956_v55 }
 0x820   :  { %2451 = vrcp.f32 %v1481_v45 }
 0x821   :  { %v1463_v5 = vpop.xlane.xlu1 %1462  ;;  %2159 = vmatmul.mubr.f32.gmra.mrb[2].mxu1 %v1509_v60 }
 0x822   :  { %v1482_v63 = vmul.f32 8.0, %v1463_v5  ;;  %2161 = vmatprep.mubr.f32.mxu1 %v1510_v7  ;;  %v2448_v35 = vpop.eup %2447 }
 0x823   :  { %v1511_v62 = vmul.f32 %v2448_v35, %v2960_v59 }
 0x824   :  { %2453 = vrcp.f32 %v1482_v63 }
 0x825   :  { %v1465_v40 = vpop.xlane.xlu0 %1464 }
 0x826   :  { %v2450_v51 = vpop.eup %2449  ;;  %v1483_v4 = vmul.f32 8.0, %v1465_v40 }
 0x827   :  { %v1512_v8 = vmul.f32 %v2450_v51, %v2964_v1 }
 0x828   :  { %2455 = vrcp.f32 %v1483_v4 }
 0x829   :  { %v1467_v57 = vpop.xlane.xlu1 %1466  ;;  %2162 = vmatmul.mubr.f32.gmra.mrb[2].mxu1 %v1511_v62 }
 0x82a   :  { %v1484_v52 = vmul.f32 8.0, %v1467_v57  ;;  %2164 = vmatprep.mubr.f32.mxu1 %v1512_v8  ;;  %v2452_v54 = vpop.eup %2451 }
 0x82b   :  { %v1513_v61 = vmul.f32 %v2452_v54, %v2968_v26 }
 0x82c   :  { %2457 = vrcp.f32 %v1484_v52 }
 0x82d   :  { %v1469_v55 = vpop.xlane.xlu0 %1468 }
 0x82e   :  { %v2454_v6 = vpop.eup %2453  ;;  %v1485_v21 = vmul.f32 8.0, %v1469_v55 }
 0x82f   :  { %v1514_v58 = vmul.f32 %v2454_v6, %v2972_v56 }
 0x830   :  { %2459 = vrcp.f32 %v1485_v21 }
 0x831   :  { %2165 = vmatmul.mubr.f32.gmra.mrb[2].mxu1 %v1513_v61 }
 0x832   :  { %2167 = vmatprep.mubr.f32.mxu1 %v1514_v58  ;;  %v2456_v1 = vpop.eup %2455 }
 0x833   :  { %v1515_v17 = vmul.f32 %v2456_v1, %v2975_v12 }
 0x836   :  { %v2458_v0 = vpop.eup %2457 }
 0x837   :  { %v1516_v59 = vmul.f32 %v2458_v0, %v2978_v11 }
 0x839   :  { %2168 = vmatmul.mubr.f32.gmra.mrb[2].mxu1 %v1515_v17 }
 0x83a   :  { %2170 = vmatprep.mubr.f32.mxu1 %v1516_v59  ;;  %v2460_v47 = vpop.eup %2459 }
 0x83b   :  { %v1517_v19 = vmul.f32 %v2460_v47, %v2981_v32 }
 0x841   :  { %2171 = vmatmul.mubr.f32.gmra.mrb[2].mxu1 %v1517_v19 }
 0x914   :  { %v2172_v24 = vpop.f32.mrb[2].mxu1 }
 0x915   :  { %v1682_v56 = vadd.f32 %v2172_v24, %v1863_v23  ;;  %v1654_v9 = vpop.f32.mrb[3].mxu1 }
 0x916   :  { %v1681_v26 = vadd.f32 %v1863_v23, %v1654_v9 }
 0x917   :  { %v1686_v25 = vmin.f32 %v1682_v56, 0.0  ;;  %vm1684_vm7 = vcmp.gt.f32.partialorder %v1682_v56, 0.0 }
 0x918   :  { %v1685_v30 = vmin.f32 %v1681_v26, 0.0  ;;  %vm1683_vm6 = vcmp.gt.f32.partialorder %v1681_v26, 0.0 }
 0x919   :  { %v1689_v20 = vmul.f32 1.442695, %v1686_v25 }
 0x91a   :  { %v1687_v41 = vmul.f32 1.442695, %v1685_v30 }
 0x91b   :  { %2461 = vpow2.f32 %v1689_v20 }
 0x91c   :  { %2463 = vpow2.f32 %v1687_v41 }
 0x925   :  { %v2462_v11 = vpop.eup %2461 }
 0x926   :  { %v2464_v2 = vpop.eup %2463  ;;  %v1865_v12 = vadd.f32 -1.0, %v2462_v11 }
 0x927   :  { %v1864_v28 = vadd.f32 -1.0, %v2464_v2 }
 0x928   :  { %v1694_v32 = vsel %vm1684_vm7, %v1682_v56, %v1865_v12 }
 0x929   :  { %v1693_v10 = vsel %vm1683_vm6, %v1681_v26, %v1864_v28 }
 0x92a   :  { %2181 = vmatprep.mubr.msk.f32.mxu1 %vm867_vm2, %v1693_v10 }
 0x92b   :  { %2182 = vmatmul.mubr.msk.f32.vlgmr.msra.gmra.mrb[4].mxu1 %vm867_vm2, %v1694_v32 }
 0x9fe   :  { %v2183_v15 = vpop.f32.mrb[4].mxu1 }
 0x9ff   :  { %v1785_v42 = vadd.f32 %v2183_v15, %v1866_v16  ;;  %v1779_v37 = vpop.f32.mrb[5].mxu1 }
 0xa00   :  { %v1780_v43 = vadd.f32 %v1866_v16, %v1779_v37 }
 0xa01   :  { %1790 = vmax.xlane.f32.xlu0 %v1785_v42 }
 0xa02   :  { %1788 = vmax.xlane.f32.xlu1 %v1780_v43 }
 0xa8e   :  { %v1791_v13 = vpop.xlane.xlu0 %1790 }
 0xa8f   :  { %v1793_v18 = vsub.f32 %v1785_v42, %v1791_v13  ;;  %v1789_v14 = vpop.xlane.xlu1 %1788 }
 0xa90   :  { %v1792_v3 = vsub.f32 %v1780_v43, %v1789_v14 }
 0xa91   :  { %v1796_v34 = vmul.f32 1.442695, %v1793_v18 }
 0xa92   :  { %v1794_v29 = vmul.f32 1.442695, %v1792_v3 }
 0xa93   :  { %2465 = vpow2.f32 %v1796_v34 }
 0xa94   :  { %2467 = vpow2.f32 %v1794_v29 }
 0xa9d   :  { %v2466_v27 = vpop.eup %2465 }
 0xa9e   :  { %v2468_v48 = vpop.eup %2467  ;;  %1800 = vadd.xlane.f32.xlu0 %v2466_v27 }
 0xa9f   :  { %1798 = vadd.xlane.f32.xlu1 %v2468_v48 }
 0xb2b   :  { %v1801_v38 = vpop.xlane.xlu0 %1800 }
 0xb2c   :  { %2469 = vlog2.f32 %v1801_v38  ;;  %v1799_v49 = vpop.xlane.xlu1 %1798 }
 0xb2d   :  { %2471 = vlog2.f32 %v1799_v49 }
 0xb36   :  { %v2470_v50 = vpop.eup %2469 }
 0xb37   :  { %v2472_v53 = vpop.eup %2471  ;;  %v1805_v22 = vmul.f32 0.6931472, %v2470_v50 }
 0xb38   :  { %v1803_v33 = vmul.f32 0.6931472, %v2472_v53 }
 0xb39   :  { %v1807_v44 = vsub.f32 %v1793_v18, %v1805_v22 }
 0xb3a   :  { %v1806_v39 = vsub.f32 %v1792_v3, %v1803_v33 }
 0xb3b   :  { %1809 = vst [vmem:[#allocation8 + $0x8] sm:$0xff] %v1807_v44 }
 0xb3c   :  { %1808 = vst [vmem:[#allocation8] sm:$0xff] %v1806_v39 }
 0xb3d   :  { %2543 = shalt.err (!%p2540_p6)
}
 0xb3e   :  { %s2544_s14 = scalar_lea.hbm %s3019_s2, 256 }
 0xb3f   :  { %p2545_p7 = scmp.ne.s32.totalorder %s3019_s2, %s2544_s14  ;;  %p2548_p8 = scmp.lt.u32.totalorder %s2544_s14, %s3019_s2 }
 0xb41   :  { %p2550_p9 = pnand %p2548_p8, %p2545_p7 }
 0xb43   :  { %2553 = shalt.err (!%p2550_p9)
}
 0xb44   :  { %1821 = dma.vmem_to_hbm [thread:$0]  %s1816_s10, 256, %s3019_s2, [#allocation5], %s2564_s0, %s2564_s0, %s2565_s5  }
 0xb45   :  { %2558 = dma.done.wait [#allocation5], 256  }
 0xb46   :  { %2559 = vsyncadd [#allocation5], 4294967040 }
 0xb47   :  { %1825 = vsyncpa [#allocation4], 1 }
 0xb48   :  { %1826 = vsyncpa [#allocation7], 1 }
 0xb49   :  { %1827 = vsyncpa [#allocation5], 1 }

</bundles_post_ra>
